<compile_context>
chip_gen: v6e
topology: v6e:2x2x1
jax: 0.10.0
libtpu: 0.0.40
codegen_flags: <defaults>
</compile_context>

<pallas_src>
import functools
import math

import jax
import jax.numpy as jnp
import numpy as np
from jax.experimental import pallas as pl
from jax.experimental.pallas import tpu as pltpu

POS_DIM = 8
NUM_HEADS = 4
LN_EPS = 1e-5


def _positional_embedding(seq_len):
    # PositionalEmbedding(demb=8) with pos_seq = arange(seq_len) + 1
    pos_seq = jnp.arange(1, seq_len + 1, dtype=jnp.float32)
    inv_freq = 1.0 / (10000.0 ** (jnp.arange(0.0, POS_DIM, 2.0, dtype=jnp.float32) / POS_DIM))
    sinusoid = pos_seq[:, None] * inv_freq[None, :]                     # (S, POS_DIM/2)
    return jnp.concatenate([jnp.sin(sinusoid), jnp.cos(sinusoid)], -1)  # (S, POS_DIM)


def _attention_kernel(x_q_ref, x_kv_ref, pos_q_ref, pos_kv_ref,
                      w_q_ref, wp_q_ref, w_kv_ref, wp_kv_ref,
                      w_out_ref, b_out_ref, gamma_ref, beta_ref,
                      y_ref, attn_ref,
                      q_scr, m_scr, l_scr, acc_scr,
                      *, num_heads, approx_softmax):
    kv_idx = pl.program_id(2)
    num_kv = pl.num_programs(2)
    mm = w_q_ref.dtype                               # bf16 (fast) or f32 (precise)

    C = x_q_ref.shape[1]
    tq = x_q_ref.shape[2]
    tk = x_kv_ref.shape[2]
    D = C // num_heads

    # ---- init: first KV step for this (batch, q-block) --------------------
    @pl.when(kv_idx == 0)
    def _():
        xq = x_q_ref[0].astype(mm)                                       # (C, tq)
        q = jnp.dot(w_q_ref[...], xq, preferred_element_type=jnp.float32)
        q += jnp.dot(wp_q_ref[...], pos_q_ref[...],                      # pos + bias (K=9)
                     preferred_element_type=jnp.float32)
        q_scr[...] = q.astype(mm)                    # 1/sqrt(D) already folded into w_q/wp_q
        m_scr[...] = jnp.full_like(m_scr, -jnp.inf)
        l_scr[...] = jnp.zeros_like(l_scr)
        acc_scr[...] = jnp.zeros_like(acc_scr)

    # ---- K/V projection for this KV block (one fused (2C, C) matmul) ------
    xk = x_kv_ref[0].astype(mm)                                          # (C, tk)
    kvp = jnp.dot(w_kv_ref[...], xk, preferred_element_type=jnp.float32)
    kvp += jnp.dot(wp_kv_ref[...], pos_kv_ref[...],
                   preferred_element_type=jnp.float32)
    kvp = kvp.astype(mm)                             # downcast once       # (2C, tk)
    k_h = kvp[:C].reshape(num_heads, D, tk)                               # (H, D, tk)
    v_h = kvp[C:].reshape(num_heads, D, tk)                               # (H, D, tk)
    q_h = q_scr[...].reshape(num_heads, D, tq)                            # (H, D, tq)

    # Scores with keys on sublanes, queries on lanes: no transposes needed.
    s = jax.lax.dot_general(k_h, q_h, (((1,), (1,)), ((0,), (0,))),
                            preferred_element_type=jnp.float32)           # (H, tk, tq)

    # Online softmax (running max / denominator), all stats in (H, 1, tq).
    m_prev = m_scr[...]
    m_new = jnp.maximum(m_prev, jnp.max(s, axis=1, keepdims=True))
    alpha = jnp.exp(m_prev - m_new)
    e = jnp.exp(s - m_new)                                                 # (H, tk, tq)
    l_scr[...] = alpha * l_scr[...] + jnp.sum(e, axis=1, keepdims=True)

    # Un-normalized PV accumulate straight into the channels-major layout.
    o_step = jax.lax.dot_general(v_h, e.astype(mm), (((2,), (1,)), ((0,), (0,))),
                                 preferred_element_type=jnp.float32)      # (H, D, tq)
    acc_scr[...] = alpha * acc_scr[...] + o_step
    m_scr[...] = m_new

    # ---- finalize: last KV step -------------------------------------------
    @pl.when(kv_idx == num_kv - 1)
    def _():
        l = l_scr[...]
        if approx_softmax:
            inv_l = pl.reciprocal(l, approx=True)    # EUP slot, off the VALU
        else:
            inv_l = 1.0 / l
        o_t = (acc_scr[...] * inv_l).reshape(C, tq)                        # (C, tq)

        # Out-projection (transposed): out^T = W_o @ o^T + b_o.
        out = jnp.dot(w_out_ref[...], o_t.astype(mm),
                      preferred_element_type=jnp.float32) + b_out_ref[...]

        # Residual + dropout + LayerNorm over channels (sublane axis).
        # TODO(synk): Dropout(p=0.1) is identity in eval mode; training-mode RNG
        #             dropout is not implemented.
        r = x_q_ref[0] + out
        mu = jnp.mean(r, axis=0, keepdims=True)
        var = jnp.mean((r - mu) * (r - mu), axis=0, keepdims=True)
        yn = (r - mu) * jax.lax.rsqrt(var + LN_EPS)
        y_ref[0] = yn * gamma_ref[...] + beta_ref[...]                     # (C, tq)

        # Attention map = mean over heads of the softmax row sums (== l / l),
        # i.e. torch.sum(attn_map, dim=-1) of the head-averaged weights.
        attn_ref[0] = jnp.mean(l * inv_l, axis=0)                          # (1, tq)


def _auto_block(S):
    # Prefer MXU-friendly full-width tiles (multiples of 256 where possible,
    # per v6e/v7x guidance; 128 still fine on v5e); fall back to the full extent.
    for cand in (512, 256, 128):
        if S % cand == 0:
            return cand
    return S


def _vmem_limit_bytes():
    # Per-generation VMEM limit with headroom for double-buffered streams:
    # ~48 MiB on v7x (64 MiB / TC), ~96 MiB on v5e/v6e (128 MiB).
    try:
        cap = pltpu.get_tpu_info().vmem_capacity_bytes
    except Exception:
        cap = 64 * 1024 * 1024
    return int(min(cap * 3 // 4, 100 * 1024 * 1024))


def _fold_params(params, C, matmul_dtype):
    """Fold Q/K/V Linears into the MHA in-projection (offline, batch-invariant)."""
    D = C // NUM_HEADS
    scale = 1.0 / math.sqrt(D)
    ipw = params["in_proj_w"]                               # (3C, C)
    ipb = params["in_proj_b"]                               # (3C,)
    ws, ps = [], []
    for j, name in enumerate(("wq", "wk", "wv")):
        w = params[name]                                    # (C, C+POS_DIM), bias-free
        m = ipw[j * C:(j + 1) * C] @ w                      # fold: in_proj_j @ W_j
        b = ipb[j * C:(j + 1) * C]
        if j == 0:                                          # fold 1/sqrt(D) into q path
            m = m * scale
            b = b * scale
        ws.append(m[:, :C])                                 # acts on x           (C, C)
        ps.append(jnp.concatenate([m[:, C:], b[:, None]], axis=1))  # pos + bias   (C, 9)
    w_q = ws[0].astype(matmul_dtype)
    wp_q = ps[0].astype(matmul_dtype)
    w_kv = jnp.concatenate(ws[1:], axis=0).astype(matmul_dtype)     # (2C, C)
    wp_kv = jnp.concatenate(ps[1:], axis=0).astype(matmul_dtype)    # (2C, 9)
    w_out = params["out_proj_w"].astype(matmul_dtype)               # (C, C)
    b_out = params["out_proj_b"][:, None].astype(jnp.float32)       # (C, 1)
    gamma = params["ln_gamma"][:, None].astype(jnp.float32)         # (C, 1)
    beta = params["ln_beta"][:, None].astype(jnp.float32)           # (C, 1)
    return w_q, wp_q, w_kv, wp_kv, w_out, b_out, gamma, beta


@functools.partial(jax.jit,
                   static_argnames=("matmul_dtype", "approx_softmax", "block_q", "block_kv"))
def attention_layer_forward(inputs, params, *, matmul_dtype=jnp.bfloat16,
                            approx_softmax=True, block_q=None, block_kv=None):
    """inputs: (B, C, H, W) float32. Returns (out (B, C, S), attn_map (B, S))."""
    B, C, Hh, Ww = inputs.shape
    S = Hh * Ww
    assert C % NUM_HEADS == 0

    bq = block_q if block_q is not None else _auto_block(S)
    bk = block_kv if block_kv is not None else _auto_block(S)
    assert S % bq == 0 and (bq % 128 == 0 or bq == S), (S, bq)
    assert S % bk == 0 and (bk % 128 == 0 or bk == S), (S, bk)

    # Free reshape to channels-major (B, C, S); no wrapper transpose, no concat.
    x = inputs.reshape(B, C, S)

    # Tiny (POS_DIM+1, S) table: positional rows + a ones row carrying the bias.
    pos_aug = jnp.concatenate([_positional_embedding(S).T,
                               jnp.ones((1, S), jnp.float32)], axis=0).astype(matmul_dtype)

    w_q, wp_q, w_kv, wp_kv, w_out, b_out, gamma, beta = _fold_params(params, C, matmul_dtype)

    kernel = functools.partial(_attention_kernel, num_heads=NUM_HEADS,
                               approx_softmax=approx_softmax)

    def _full(shape):
        return pl.BlockSpec(shape, lambda b, qi, kv: (0,) * len(shape))

    grid = (B, S // bq, S // bk)

    y, attn = pl.pallas_call(
        kernel,
        out_shape=(jax.ShapeDtypeStruct((B, C, S), jnp.float32),
                   jax.ShapeDtypeStruct((B, 1, S), jnp.float32)),
        grid=grid,
        in_specs=[
            pl.BlockSpec((1, C, bq), lambda b, qi, kv: (b, 0, qi)),   # x, query block
            pl.BlockSpec((1, C, bk), lambda b, qi, kv: (b, 0, kv)),   # x, kv block
            pl.BlockSpec((POS_DIM + 1, bq), lambda b, qi, kv: (0, qi)),   # pos(+1) q
            pl.BlockSpec((POS_DIM + 1, bk), lambda b, qi, kv: (0, kv)),   # pos(+1) kv
            _full((C, C)),                  # fused q weight
            _full((C, POS_DIM + 1)),        # q positional/bias weight
            _full((2 * C, C)),              # fused k|v weight
            _full((2 * C, POS_DIM + 1)),    # k|v positional/bias weight
            _full((C, C)),                  # out-proj weight
            _full((C, 1)),                  # out-proj bias (column)
            _full((C, 1)),                  # LN gamma (column)
            _full((C, 1)),                  # LN beta  (column)
        ],
        out_specs=(pl.BlockSpec((1, C, bq), lambda b, qi, kv: (b, 0, qi)),   # y (B, C, S)
                   pl.BlockSpec((1, 1, bq), lambda b, qi, kv: (b, 0, qi))),  # attn, lane-dense
        scratch_shapes=[
            pltpu.VMEM((C, bq), matmul_dtype),                               # q block
            pltpu.VMEM((NUM_HEADS, 1, bq), jnp.float32),                     # running max
            pltpu.VMEM((NUM_HEADS, 1, bq), jnp.float32),                     # running denom
            pltpu.VMEM((NUM_HEADS, C // NUM_HEADS, bq), jnp.float32),        # PV accumulator
        ],
        compiler_params=pltpu.CompilerParams(
            dimension_semantics=("parallel", "parallel", "arbitrary"),
            vmem_limit_bytes=_vmem_limit_bytes()),
    )(x, x, pos_aug, pos_aug, w_q, wp_q, w_kv, wp_kv, w_out, b_out, gamma, beta)

    return y, attn[:, 0, :]


def init_params(key, hidden):
    ks = jax.random.split(key, 9)
    in_dim = hidden + POS_DIM
    s = 0.05
    return {
        "wq": s * jax.random.normal(ks[0], (hidden, in_dim), jnp.float32),
        "wk": s * jax.random.normal(ks[1], (hidden, in_dim), jnp.float32),
        "wv": s * jax.random.normal(ks[2], (hidden, in_dim), jnp.float32),
        "in_proj_w": s * jax.random.normal(ks[3], (3 * hidden, hidden), jnp.float32),
        "in_proj_b": s * jax.random.normal(ks[4], (3 * hidden,), jnp.float32),
        "out_proj_w": s * jax.random.normal(ks[5], (hidden, hidden), jnp.float32),
        "out_proj_b": s * jax.random.normal(ks[6], (hidden,), jnp.float32),
        "ln_gamma": 1.0 + 0.1 * jax.random.normal(ks[7], (hidden,), jnp.float32),
        "ln_beta": 0.1 * jax.random.normal(ks[8], (hidden,), jnp.float32),
    }


def reference_forward(inputs, params):
    """Pure-JAX reference mirroring the PyTorch forward (eval mode, f32)."""
    B, C, Hh, Ww = inputs.shape
    S = Hh * Ww
    x = jnp.transpose(inputs.reshape(B, C, S), (0, 2, 1))
    pos_emb = _positional_embedding(S)
    xp = jnp.concatenate([x, jnp.broadcast_to(pos_emb[None], (B, S, POS_DIM))], -1)

    Q = xp @ params["wq"].T
    K = xp @ params["wk"].T
    V = xp @ params["wv"].T

    ipw, ipb = params["in_proj_w"], params["in_proj_b"]
    q = Q @ ipw[:C].T + ipb[:C]
    k = K @ ipw[C:2 * C].T + ipb[C:2 * C]
    v = V @ ipw[2 * C:].T + ipb[2 * C:]

    D = C // NUM_HEADS

    def split(t):
        return t.reshape(B, S, NUM_HEADS, D).transpose(0, 2, 1, 3)

    qh, kh, vh = split(q), split(k), split(v)
    scores = jnp.einsum("bhsd,bhtd->bhst", qh, kh) / math.sqrt(D)
    p = jax.nn.softmax(scores, axis=-1)
    oh = jnp.einsum("bhst,bhtd->bhsd", p, vh)
    o = oh.transpose(0, 2, 1, 3).reshape(B, S, C)
    out = o @ params["out_proj_w"].T + params["out_proj_b"]

    attn_map = jnp.sum(jnp.mean(p, axis=1), axis=-1)                   # (B, S)

    r = x + out
    mu = r.mean(-1, keepdims=True)
    var = ((r - mu) ** 2).mean(-1, keepdims=True)
    y = (r - mu) / jnp.sqrt(var + LN_EPS) * params["ln_gamma"] + params["ln_beta"]
    return jnp.transpose(y, (0, 2, 1)), attn_map


if __name__ == "__main__":
    key = jax.random.PRNGKey(0)
    k_in, k_par = jax.random.split(key)

    # hidden_dim=32, heads=4, spatial 16x16 -> seq S = 256 (2 q-blocks x 2 kv-blocks).
    B, C, Hh, Ww = 2, 32, 16, 16
    inputs = jax.random.normal(k_in, (B, C, Hh, Ww), jnp.float32)
    params = init_params(k_par, C)

    with jax.default_matmul_precision("highest"):
        y_ref, attn_expected = reference_forward(inputs, params)

    # Precise path, explicitly tiled (128x128 blocks) -> exercises the online softmax.
    y32, a32 = attention_layer_forward(inputs, params, matmul_dtype=jnp.float32,
                                       approx_softmax=False, block_q=128, block_kv=128)
    jax.block_until_ready((y32, a32))
    np.testing.assert_allclose(np.asarray(y32), np.asarray(y_ref), rtol=2e-3, atol=2e-3)
    np.testing.assert_allclose(np.asarray(a32), np.asarray(attn_expected), rtol=2e-3, atol=2e-3)

    # Fast path (default): bf16 MXU operands + EUP approximate reciprocal, auto tiles.
    y16, a16 = attention_layer_forward(inputs, params)
    jax.block_until_ready((y16, a16))
    np.testing.assert_allclose(np.asarray(y16), np.asarray(y_ref), rtol=2e-2, atol=2e-2)
    np.testing.assert_allclose(np.asarray(a16), np.asarray(attn_expected), rtol=2e-2, atol=2e-2)

    print("KERNEL_OK")
</pallas_src>

<mosaic_0001>
module attributes {stable_mosaic.version = 11 : i64} {
  func.func @_attention_kernel(%arg0: i32, %arg1: i32, %arg2: i32, %arg3: memref<1x32x128xf32, #tpu.memory_space<vmem>>, %arg4: memref<1x32x128xf32, #tpu.memory_space<vmem>>, %arg5: memref<9x128xf32, #tpu.memory_space<vmem>>, %arg6: memref<9x128xf32, #tpu.memory_space<vmem>>, %arg7: memref<32x32xf32, #tpu.memory_space<vmem>>, %arg8: memref<32x9xf32, #tpu.memory_space<vmem>>, %arg9: memref<64x32xf32, #tpu.memory_space<vmem>>, %arg10: memref<64x9xf32, #tpu.memory_space<vmem>>, %arg11: memref<32x32xf32, #tpu.memory_space<vmem>>, %arg12: memref<32x1xf32, #tpu.memory_space<vmem>>, %arg13: memref<32x1xf32, #tpu.memory_space<vmem>>, %arg14: memref<32x1xf32, #tpu.memory_space<vmem>>, %arg15: memref<1x32x128xf32, #tpu.memory_space<vmem>>, %arg16: memref<1x1x128xf32, #tpu.memory_space<vmem>>, %arg17: memref<32x128xf32, #tpu.memory_space<vmem>>, %arg18: memref<4x1x128xf32, #tpu.memory_space<vmem>>, %arg19: memref<4x1x128xf32, #tpu.memory_space<vmem>>, %arg20: memref<4x8x128xf32, #tpu.memory_space<vmem>>) attributes {dimension_semantics = [#tpu.dimension_semantics<parallel>, #tpu.dimension_semantics<parallel>, #tpu.dimension_semantics<arbitrary>], iteration_bounds = array<i64: 2, 2, 2>, scalar_prefetch = 0 : i64, scratch_operands = 4 : i64, tpu.core_type = #tpu.core_type<tc>, window_params = [{transform_indices = @transform_0, window_bounds = array<i64: 1, 32, 128>}, {transform_indices = @transform_1, window_bounds = array<i64: 1, 32, 128>}, {transform_indices = @transform_2, window_bounds = array<i64: 9, 128>}, {transform_indices = @transform_3, window_bounds = array<i64: 9, 128>}, {pipeline_mode = #tpu.pipeline_mode<synchronous>, transform_indices = @transform_4, window_bounds = array<i64: 32, 32>}, {pipeline_mode = #tpu.pipeline_mode<synchronous>, transform_indices = @transform_5, window_bounds = array<i64: 32, 9>}, {pipeline_mode = #tpu.pipeline_mode<synchronous>, transform_indices = @transform_6, window_bounds = array<i64: 64, 32>}, {pipeline_mode = #tpu.pipeline_mode<synchronous>, transform_indices = @transform_7, window_bounds = array<i64: 64, 9>}, {pipeline_mode = #tpu.pipeline_mode<synchronous>, transform_indices = @transform_8, window_bounds = array<i64: 32, 32>}, {pipeline_mode = #tpu.pipeline_mode<synchronous>, transform_indices = @transform_9, window_bounds = array<i64: 32, 1>}, {pipeline_mode = #tpu.pipeline_mode<synchronous>, transform_indices = @transform_10, window_bounds = array<i64: 32, 1>}, {pipeline_mode = #tpu.pipeline_mode<synchronous>, transform_indices = @transform_11, window_bounds = array<i64: 32, 1>}, {transform_indices = @transform_12, window_bounds = array<i64: 1, 32, 128>}, {transform_indices = @transform_13, window_bounds = array<i64: 1, 1, 128>}]} {
    %c0_i32 = arith.constant 0 : i32
    %0 = arith.cmpi eq, %arg2, %c0_i32 : i32
    %1 = arith.extui %0 : i1 to i32
    %c0_i32_0 = arith.constant 0 : i32
    %2 = arith.cmpi ne, %1, %c0_i32_0 : i32
    scf.if %2 {
      %c0_35 = arith.constant 0 : index
      %c0_36 = arith.constant 0 : index
      %c0_37 = arith.constant 0 : index
      %43 = vector.load %arg3[%c0_35, %c0_36, %c0_37] : memref<1x32x128xf32, #tpu.memory_space<vmem>>, vector<1x32x128xf32>
      %44 = vector.shape_cast %43 : vector<1x32x128xf32> to vector<32x128xf32>
      %c0_38 = arith.constant 0 : index
      %c0_39 = arith.constant 0 : index
      %45 = vector.load %arg7[%c0_38, %c0_39] : memref<32x32xf32, #tpu.memory_space<vmem>>, vector<32x32xf32>
      %cst_40 = arith.constant dense<0.000000e+00> : vector<32x128xf32>
      %46 = tpu.matmul %45, %44, %cst_40 {dimension_numbers = #tpu.dot_dimension_numbers<[1], [0], [0], [1], [0, 0, 1, 1], [], []>} : vector<32x32xf32>, vector<32x128xf32>, vector<32x128xf32> -> vector<32x128xf32>
      %c0_41 = arith.constant 0 : index
      %c0_42 = arith.constant 0 : index
      %47 = vector.load %arg8[%c0_41, %c0_42] : memref<32x9xf32, #tpu.memory_space<vmem>>, vector<32x9xf32>
      %c0_43 = arith.constant 0 : index
      %c0_44 = arith.constant 0 : index
      %48 = vector.load %arg5[%c0_43, %c0_44] : memref<9x128xf32, #tpu.memory_space<vmem>>, vector<9x128xf32>
      %cst_45 = arith.constant dense<0.000000e+00> : vector<32x128xf32>
      %49 = tpu.matmul %47, %48, %cst_45 {dimension_numbers = #tpu.dot_dimension_numbers<[1], [0], [0], [1], [0, 0, 1, 1], [], []>} : vector<32x9xf32>, vector<9x128xf32>, vector<32x128xf32> -> vector<32x128xf32>
      %50 = arith.addf %46, %49 : vector<32x128xf32>
      %c0_46 = arith.constant 0 : index
      %c0_47 = arith.constant 0 : index
      %51 = vector.load %arg17[%c0_46, %c0_47] : memref<32x128xf32, #tpu.memory_space<vmem>>, vector<32x128xf32>
      tpu.vector_store %arg17[%c0_46, %c0_47], %50 {strides = array<i32>} : memref<32x128xf32, #tpu.memory_space<vmem>>, vector<32x128xf32>,
      %cst_48 = arith.constant 0xFF800000 : f32
      %52 = vector.broadcast %cst_48 : f32 to vector<4x1x128xf32>
      %c0_49 = arith.constant 0 : index
      %c0_50 = arith.constant 0 : index
      %c0_51 = arith.constant 0 : index
      %53 = vector.load %arg18[%c0_49, %c0_50, %c0_51] : memref<4x1x128xf32, #tpu.memory_space<vmem>>, vector<4x1x128xf32>
      tpu.vector_store %arg18[%c0_49, %c0_50, %c0_51], %52 {strides = array<i32>} : memref<4x1x128xf32, #tpu.memory_space<vmem>>, vector<4x1x128xf32>,
      %cst_52 = arith.constant 0.000000e+00 : f32
      %54 = vector.broadcast %cst_52 : f32 to vector<4x1x128xf32>
      %c0_53 = arith.constant 0 : index
      %c0_54 = arith.constant 0 : index
      %c0_55 = arith.constant 0 : index
      %55 = vector.load %arg19[%c0_53, %c0_54, %c0_55] : memref<4x1x128xf32, #tpu.memory_space<vmem>>, vector<4x1x128xf32>
      tpu.vector_store %arg19[%c0_53, %c0_54, %c0_55], %54 {strides = array<i32>} : memref<4x1x128xf32, #tpu.memory_space<vmem>>, vector<4x1x128xf32>,
      %cst_56 = arith.constant 0.000000e+00 : f32
      %56 = vector.broadcast %cst_56 : f32 to vector<4x8x128xf32>
      %c0_57 = arith.constant 0 : index
      %c0_58 = arith.constant 0 : index
      %c0_59 = arith.constant 0 : index
      %57 = vector.load %arg20[%c0_57, %c0_58, %c0_59] : memref<4x8x128xf32, #tpu.memory_space<vmem>>, vector<4x8x128xf32>
      tpu.vector_store %arg20[%c0_57, %c0_58, %c0_59], %56 {strides = array<i32>} : memref<4x8x128xf32, #tpu.memory_space<vmem>>, vector<4x8x128xf32>,
    } else {
    }
    %c0 = arith.constant 0 : index
    %c0_1 = arith.constant 0 : index
    %c0_2 = arith.constant 0 : index
    %3 = vector.load %arg4[%c0, %c0_1, %c0_2] : memref<1x32x128xf32, #tpu.memory_space<vmem>>, vector<1x32x128xf32>
    %4 = vector.shape_cast %3 : vector<1x32x128xf32> to vector<32x128xf32>
    %c0_3 = arith.constant 0 : index
    %c0_4 = arith.constant 0 : index
    %5 = vector.load %arg9[%c0_3, %c0_4] : memref<64x32xf32, #tpu.memory_space<vmem>>, vector<64x32xf32>
    %cst = arith.constant dense<0.000000e+00> : vector<64x128xf32>
    %6 = tpu.matmul %5, %4, %cst {dimension_numbers = #tpu.dot_dimension_numbers<[1], [0], [0], [1], [0, 0, 1, 1], [], []>} : vector<64x32xf32>, vector<32x128xf32>, vector<64x128xf32> -> vector<64x128xf32>
    %c0_5 = arith.constant 0 : index
    %c0_6 = arith.constant 0 : index
    %7 = vector.load %arg10[%c0_5, %c0_6] : memref<64x9xf32, #tpu.memory_space<vmem>>, vector<64x9xf32>
    %c0_7 = arith.constant 0 : index
    %c0_8 = arith.constant 0 : index
    %8 = vector.load %arg6[%c0_7, %c0_8] : memref<9x128xf32, #tpu.memory_space<vmem>>, vector<9x128xf32>
    %cst_9 = arith.constant dense<0.000000e+00> : vector<64x128xf32>
    %9 = tpu.matmul %7, %8, %cst_9 {dimension_numbers = #tpu.dot_dimension_numbers<[1], [0], [0], [1], [0, 0, 1, 1], [], []>} : vector<64x9xf32>, vector<9x128xf32>, vector<64x128xf32> -> vector<64x128xf32>
    %10 = arith.addf %6, %9 : vector<64x128xf32>
    %11 = vector.extract_strided_slice %10 {offsets = [0, 0], sizes = [32, 128], strides = [1, 1]} : vector<64x128xf32> to vector<32x128xf32>
    %12 = vector.shape_cast %11 : vector<32x128xf32> to vector<4x8x128xf32>
    %13 = vector.extract_strided_slice %10 {offsets = [32, 0], sizes = [32, 128], strides = [1, 1]} : vector<64x128xf32> to vector<32x128xf32>
    %14 = vector.shape_cast %13 : vector<32x128xf32> to vector<4x8x128xf32>
    %c0_10 = arith.constant 0 : index
    %c0_11 = arith.constant 0 : index
    %15 = vector.load %arg17[%c0_10, %c0_11] : memref<32x128xf32, #tpu.memory_space<vmem>>, vector<32x128xf32>
    %16 = vector.shape_cast %15 : vector<32x128xf32> to vector<4x8x128xf32>
    %cst_12 = arith.constant dense<0.000000e+00> : vector<4x128x128xf32>
    %17 = tpu.matmul %12, %16, %cst_12 {dimension_numbers = #tpu.dot_dimension_numbers<[1], [1], [2], [2], [0, 0, 0, 2, 1, 2], [0], [0]>} : vector<4x8x128xf32>, vector<4x8x128xf32>, vector<4x128x128xf32> -> vector<4x128x128xf32>
    %c0_13 = arith.constant 0 : index
    %c0_14 = arith.constant 0 : index
    %c0_15 = arith.constant 0 : index
    %18 = vector.load %arg18[%c0_13, %c0_14, %c0_15] : memref<4x1x128xf32, #tpu.memory_space<vmem>>, vector<4x1x128xf32>
    %cst_16 = arith.constant dense<0xFF800000> : vector<4x128xf32>
    %19 = vector.multi_reduction <maximumf>, %17, %cst_16 [1] : vector<4x128x128xf32> to vector<4x128xf32>
    %20 = vector.shape_cast %19 : vector<4x128xf32> to vector<4x1x128xf32>
    %21 = arith.maximumf %18, %20 : vector<4x1x128xf32>
    %22 = arith.subf %18, %21 : vector<4x1x128xf32>
    %23 = math.exp %22 : vector<4x1x128xf32>
    %24 = vector.broadcast %21 : vector<4x1x128xf32> to vector<4x128x128xf32>
    %25 = arith.subf %17, %24 : vector<4x128x128xf32>
    %26 = math.exp %25 : vector<4x128x128xf32>
    %c0_17 = arith.constant 0 : index
    %c0_18 = arith.constant 0 : index
    %c0_19 = arith.constant 0 : index
    %27 = vector.load %arg19[%c0_17, %c0_18, %c0_19] : memref<4x1x128xf32, #tpu.memory_space<vmem>>, vector<4x1x128xf32>
    %28 = arith.mulf %23, %27 : vector<4x1x128xf32>
    %cst_20 = arith.constant dense<0.000000e+00> : vector<4x128xf32>
    %29 = vector.multi_reduction <add>, %26, %cst_20 [1] : vector<4x128x128xf32> to vector<4x128xf32>
    %30 = vector.shape_cast %29 : vector<4x128xf32> to vector<4x1x128xf32>
    %31 = arith.addf %28, %30 : vector<4x1x128xf32>
    %c0_21 = arith.constant 0 : index
    %c0_22 = arith.constant 0 : index
    %c0_23 = arith.constant 0 : index
    %32 = vector.load %arg19[%c0_21, %c0_22, %c0_23] : memref<4x1x128xf32, #tpu.memory_space<vmem>>, vector<4x1x128xf32>
    tpu.vector_store %arg19[%c0_21, %c0_22, %c0_23], %31 {strides = array<i32>} : memref<4x1x128xf32, #tpu.memory_space<vmem>>, vector<4x1x128xf32>,
    %cst_24 = arith.constant dense<0.000000e+00> : vector<4x8x128xf32>
    %33 = tpu.matmul %14, %26, %cst_24 {dimension_numbers = #tpu.dot_dimension_numbers<[2], [1], [1], [2], [0, 0, 0, 1, 1, 2], [0], [0]>} : vector<4x8x128xf32>, vector<4x128x128xf32>, vector<4x8x128xf32> -> vector<4x8x128xf32>
    %c0_25 = arith.constant 0 : index
    %c0_26 = arith.constant 0 : index
    %c0_27 = arith.constant 0 : index
    %34 = vector.load %arg20[%c0_25, %c0_26, %c0_27] : memref<4x8x128xf32, #tpu.memory_space<vmem>>, vector<4x8x128xf32>
    %35 = vector.broadcast %23 : vector<4x1x128xf32> to vector<4x8x128xf32>
    %36 = arith.mulf %35, %34 : vector<4x8x128xf32>
    %37 = arith.addf %36, %33 : vector<4x8x128xf32>
    %c0_28 = arith.constant 0 : index
    %c0_29 = arith.constant 0 : index
    %c0_30 = arith.constant 0 : index
    %38 = vector.load %arg20[%c0_28, %c0_29, %c0_30] : memref<4x8x128xf32, #tpu.memory_space<vmem>>, vector<4x8x128xf32>
    tpu.vector_store %arg20[%c0_28, %c0_29, %c0_30], %37 {strides = array<i32>} : memref<4x8x128xf32, #tpu.memory_space<vmem>>, vector<4x8x128xf32>,
    %c0_31 = arith.constant 0 : index
    %c0_32 = arith.constant 0 : index
    %c0_33 = arith.constant 0 : index
    %39 = vector.load %arg18[%c0_31, %c0_32, %c0_33] : memref<4x1x128xf32, #tpu.memory_space<vmem>>, vector<4x1x128xf32>
    tpu.vector_store %arg18[%c0_31, %c0_32, %c0_33], %21 {strides = array<i32>} : memref<4x1x128xf32, #tpu.memory_space<vmem>>, vector<4x1x128xf32>,
    %c1_i32 = arith.constant 1 : i32
    %40 = arith.cmpi eq, %arg2, %c1_i32 : i32
    %41 = arith.extui %40 : i1 to i32
    %c0_i32_34 = arith.constant 0 : i32
    %42 = arith.cmpi ne, %41, %c0_i32_34 : i32
    scf.if %42 {
      %c0_35 = arith.constant 0 : index
      %c0_36 = arith.constant 0 : index
      %c0_37 = arith.constant 0 : index
      %43 = vector.load %arg19[%c0_35, %c0_36, %c0_37] : memref<4x1x128xf32, #tpu.memory_space<vmem>>, vector<4x1x128xf32>
      %cst_38 = arith.constant 1.000000e+00 : f32
      %44 = vector.broadcast %cst_38 : f32 to vector<4x1x128xf32>
      %45 = arith.divf %44, %43 : vector<4x1x128xf32>
      %c0_39 = arith.constant 0 : index
      %c0_40 = arith.constant 0 : index
      %c0_41 = arith.constant 0 : index
      %46 = vector.load %arg20[%c0_39, %c0_40, %c0_41] : memref<4x8x128xf32, #tpu.memory_space<vmem>>, vector<4x8x128xf32>
      %47 = vector.broadcast %45 : vector<4x1x128xf32> to vector<4x8x128xf32>
      %48 = arith.mulf %46, %47 : vector<4x8x128xf32>
      %49 = vector.shape_cast %48 : vector<4x8x128xf32> to vector<32x128xf32>
      %c0_42 = arith.constant 0 : index
      %c0_43 = arith.constant 0 : index
      %50 = vector.load %arg11[%c0_42, %c0_43] : memref<32x32xf32, #tpu.memory_space<vmem>>, vector<32x32xf32>
      %cst_44 = arith.constant dense<0.000000e+00> : vector<32x128xf32>
      %51 = tpu.matmul %50, %49, %cst_44 {dimension_numbers = #tpu.dot_dimension_numbers<[1], [0], [0], [1], [0, 0, 1, 1], [], []>} : vector<32x32xf32>, vector<32x128xf32>, vector<32x128xf32> -> vector<32x128xf32>
      %c0_45 = arith.constant 0 : index
      %c0_46 = arith.constant 0 : index
      %52 = vector.load %arg12[%c0_45, %c0_46] : memref<32x1xf32, #tpu.memory_space<vmem>>, vector<32x1xf32>
      %53 = vector.broadcast %52 : vector<32x1xf32> to vector<32x128xf32>
      %54 = arith.addf %51, %53 : vector<32x128xf32>
      %c0_47 = arith.constant 0 : index
      %c0_48 = arith.constant 0 : index
      %c0_49 = arith.constant 0 : index
      %55 = vector.load %arg3[%c0_47, %c0_48, %c0_49] : memref<1x32x128xf32, #tpu.memory_space<vmem>>, vector<1x32x128xf32>
      %56 = vector.shape_cast %55 : vector<1x32x128xf32> to vector<32x128xf32>
      %57 = arith.addf %56, %54 : vector<32x128xf32>
      %cst_50 = arith.constant dense<0.000000e+00> : vector<128xf32>
      %58 = vector.multi_reduction <add>, %57, %cst_50 [0] : vector<32x128xf32> to vector<128xf32>
      %59 = vector.shape_cast %58 : vector<128xf32> to vector<1x128xf32>
      %cst_51 = arith.constant 3.200000e+01 : f32
      %60 = vector.broadcast %cst_51 : f32 to vector<1x128xf32>
      %61 = arith.divf %59, %60 : vector<1x128xf32>
      %62 = vector.broadcast %61 : vector<1x128xf32> to vector<32x128xf32>
      %63 = arith.subf %57, %62 : vector<32x128xf32>
      %64 = vector.broadcast %61 : vector<1x128xf32> to vector<32x128xf32>
      %65 = arith.subf %57, %64 : vector<32x128xf32>
      %66 = arith.mulf %63, %65 : vector<32x128xf32>
      %cst_52 = arith.constant dense<0.000000e+00> : vector<128xf32>
      %67 = vector.multi_reduction <add>, %66, %cst_52 [0] : vector<32x128xf32> to vector<128xf32>
      %68 = vector.shape_cast %67 : vector<128xf32> to vector<1x128xf32>
      %cst_53 = arith.constant 3.200000e+01 : f32
      %69 = vector.broadcast %cst_53 : f32 to vector<1x128xf32>
      %70 = arith.divf %68, %69 : vector<1x128xf32>
      %71 = vector.broadcast %61 : vector<1x128xf32> to vector<32x128xf32>
      %72 = arith.subf %57, %71 : vector<32x128xf32>
      %cst_54 = arith.constant 9.99999974E-6 : f32
      %73 = vector.broadcast %cst_54 : f32 to vector<1x128xf32>
      %74 = arith.addf %70, %73 : vector<1x128xf32>
      %75 = math.rsqrt %74 : vector<1x128xf32>
      %76 = vector.broadcast %75 : vector<1x128xf32> to vector<32x128xf32>
      %77 = arith.mulf %72, %76 : vector<32x128xf32>
      %c0_55 = arith.constant 0 : index
      %c0_56 = arith.constant 0 : index
      %78 = vector.load %arg13[%c0_55, %c0_56] : memref<32x1xf32, #tpu.memory_space<vmem>>, vector<32x1xf32>
      %79 = vector.broadcast %78 : vector<32x1xf32> to vector<32x128xf32>
      %80 = arith.mulf %77, %79 : vector<32x128xf32>
      %c0_57 = arith.constant 0 : index
      %c0_58 = arith.constant 0 : index
      %81 = vector.load %arg14[%c0_57, %c0_58] : memref<32x1xf32, #tpu.memory_space<vmem>>, vector<32x1xf32>
      %82 = vector.broadcast %81 : vector<32x1xf32> to vector<32x128xf32>
      %83 = arith.addf %80, %82 : vector<32x128xf32>
      %c0_59 = arith.constant 0 : index
      %c0_60 = arith.constant 0 : index
      %c0_61 = arith.constant 0 : index
      %84 = vector.load %arg15[%c0_59, %c0_60, %c0_61] : memref<1x32x128xf32, #tpu.memory_space<vmem>>, vector<1x32x128xf32>
      %85 = vector.shape_cast %84 : vector<1x32x128xf32> to vector<32x128xf32>
      %86 = vector.shape_cast %83 : vector<32x128xf32> to vector<1x32x128xf32>
      tpu.vector_store %arg15[%c0_59, %c0_60, %c0_61], %86 {strides = array<i32>} : memref<1x32x128xf32, #tpu.memory_space<vmem>>, vector<1x32x128xf32>,
      %87 = arith.mulf %43, %45 : vector<4x1x128xf32>
      %cst_62 = arith.constant dense<0.000000e+00> : vector<1x128xf32>
      %88 = vector.multi_reduction <add>, %87, %cst_62 [0] : vector<4x1x128xf32> to vector<1x128xf32>
      %cst_63 = arith.constant 4.000000e+00 : f32
      %89 = vector.broadcast %cst_63 : f32 to vector<1x128xf32>
      %90 = arith.divf %88, %89 : vector<1x128xf32>
      %c0_64 = arith.constant 0 : index
      %c0_65 = arith.constant 0 : index
      %c0_66 = arith.constant 0 : index
      %91 = vector.load %arg16[%c0_64, %c0_65, %c0_66] : memref<1x1x128xf32, #tpu.memory_space<vmem>>, vector<1x1x128xf32>
      %92 = vector.shape_cast %91 : vector<1x1x128xf32> to vector<1x128xf32>
      %93 = vector.shape_cast %90 : vector<1x128xf32> to vector<1x1x128xf32>
      tpu.vector_store %arg16[%c0_64, %c0_65, %c0_66], %93 {strides = array<i32>} : memref<1x1x128xf32, #tpu.memory_space<vmem>>, vector<1x1x128xf32>,
    } else {
    }
    return
  }
  func.func @transform_0(%arg0: i32, %arg1: i32, %arg2: i32) -> (i32, i32, i32) {
    %c0_i32 = arith.constant 0 : i32
    %c0_i32_0 = arith.constant 0 : i32
    return %arg0, %c0_i32, %arg1 : i32, i32, i32
  }
  func.func @transform_1(%arg0: i32, %arg1: i32, %arg2: i32) -> (i32, i32, i32) {
    %c0_i32 = arith.constant 0 : i32
    %c0_i32_0 = arith.constant 0 : i32
    return %arg0, %c0_i32, %arg2 : i32, i32, i32
  }
  func.func @transform_2(%arg0: i32, %arg1: i32, %arg2: i32) -> (i32, i32) {
    %c0_i32 = arith.constant 0 : i32
    %c0_i32_0 = arith.constant 0 : i32
    return %c0_i32, %arg1 : i32, i32
  }
  func.func @transform_3(%arg0: i32, %arg1: i32, %arg2: i32) -> (i32, i32) {
    %c0_i32 = arith.constant 0 : i32
    %c0_i32_0 = arith.constant 0 : i32
    return %c0_i32, %arg2 : i32, i32
  }
  func.func @transform_4(%arg0: i32, %arg1: i32, %arg2: i32) -> (i32, i32) {
    %c0_i32 = arith.constant 0 : i32
    %c0_i32_0 = arith.constant 0 : i32
    %c0_i32_1 = arith.constant 0 : i32
    return %c0_i32, %c0_i32_0 : i32, i32
  }
  func.func @transform_5(%arg0: i32, %arg1: i32, %arg2: i32) -> (i32, i32) {
    %c0_i32 = arith.constant 0 : i32
    %c0_i32_0 = arith.constant 0 : i32
    %c0_i32_1 = arith.constant 0 : i32
    return %c0_i32, %c0_i32_0 : i32, i32
  }
  func.func @transform_6(%arg0: i32, %arg1: i32, %arg2: i32) -> (i32, i32) {
    %c0_i32 = arith.constant 0 : i32
    %c0_i32_0 = arith.constant 0 : i32
    %c0_i32_1 = arith.constant 0 : i32
    return %c0_i32, %c0_i32_0 : i32, i32
  }
  func.func @transform_7(%arg0: i32, %arg1: i32, %arg2: i32) -> (i32, i32) {
    %c0_i32 = arith.constant 0 : i32
    %c0_i32_0 = arith.constant 0 : i32
    %c0_i32_1 = arith.constant 0 : i32
    return %c0_i32, %c0_i32_0 : i32, i32
  }
  func.func @transform_8(%arg0: i32, %arg1: i32, %arg2: i32) -> (i32, i32) {
    %c0_i32 = arith.constant 0 : i32
    %c0_i32_0 = arith.constant 0 : i32
    %c0_i32_1 = arith.constant 0 : i32
    return %c0_i32, %c0_i32_0 : i32, i32
  }
  func.func @transform_9(%arg0: i32, %arg1: i32, %arg2: i32) -> (i32, i32) {
    %c0_i32 = arith.constant 0 : i32
    %c0_i32_0 = arith.constant 0 : i32
    %c0_i32_1 = arith.constant 0 : i32
    return %c0_i32, %c0_i32_0 : i32, i32
  }
  func.func @transform_10(%arg0: i32, %arg1: i32, %arg2: i32) -> (i32, i32) {
    %c0_i32 = arith.constant 0 : i32
    %c0_i32_0 = arith.constant 0 : i32
    %c0_i32_1 = arith.constant 0 : i32
    return %c0_i32, %c0_i32_0 : i32, i32
  }
  func.func @transform_11(%arg0: i32, %arg1: i32, %arg2: i32) -> (i32, i32) {
    %c0_i32 = arith.constant 0 : i32
    %c0_i32_0 = arith.constant 0 : i32
    %c0_i32_1 = arith.constant 0 : i32
    return %c0_i32, %c0_i32_0 : i32, i32
  }
  func.func @transform_12(%arg0: i32, %arg1: i32, %arg2: i32) -> (i32, i32, i32) {
    %c0_i32 = arith.constant 0 : i32
    %c0_i32_0 = arith.constant 0 : i32
    return %arg0, %c0_i32, %arg1 : i32, i32, i32
  }
  func.func @transform_13(%arg0: i32, %arg1: i32, %arg2: i32) -> (i32, i32, i32) {
    %c0_i32 = arith.constant 0 : i32
    %c0_i32_0 = arith.constant 0 : i32
    return %arg0, %c0_i32, %arg1 : i32, i32, i32
  }
}

</mosaic_0001>

<bundles_post_ra>
// kernel: attention_layer_forward.1
= control target key start
LH: loop header
LB: loop body
LE: loop exit
PB: predicated region body
PF: predicated region fallthrough
CT: control target
= control target key end

     0   :  { %s5713_s0 = inlined_call_operand.vmem [shape: f32[2,32,256], index: 0, kind: input, shape index: {}, may-alias: {0,1}]   ;;  %s5714_s1 = inlined_call_operand.vmem [shape: f32[2,32,256], index: 1, kind: input, shape index: {}, may-alias: {0,1}]   ;;  %s5715_s2 = inlined_call_operand.vmem [shape: f32[9,256], index: 2, kind: input, shape index: {}, may-alias: {2,3}]   ;;  %s5716_s3 = inlined_call_operand.vmem [shape: f32[9,256], index: 3, kind: input, shape index: {}, may-alias: {2,3}]   ;;  %s5717_s4 = inlined_call_operand.vmem [shape: f32[32,32], index: 4, kind: input, shape index: {}]   ;;  %s5718_s5 = inlined_call_operand.vmem [shape: f32[32,9], index: 5, kind: input, shape index: {}]   ;;  %s5719_s6 = inlined_call_operand.vmem [shape: f32[64,32], index: 6, kind: input, shape index: {}]   ;;  %s5720_s7 = inlined_call_operand.vmem [shape: f32[64,9], index: 7, kind: input, shape index: {}]   ;;  %s5721_s8 = inlined_call_operand.vmem [shape: f32[32,32], index: 8, kind: input, shape index: {}]   ;;  %s5722_s9 = inlined_call_operand.vmem [shape: f32[32,1], index: 9, kind: input, shape index: {}]   ;;  %s5723_s10 = inlined_call_operand.vmem [shape: f32[32,1], index: 10, kind: input, shape index: {}]   ;;  %s5724_s11 = inlined_call_operand.vmem [shape: f32[32,1], index: 11, kind: input, shape index: {}]   ;;  %s5725_s12 = inlined_call_operand.hbm [shape: f32[2,32,256], index: 12, kind: output, shape index: {0}]   ;;  %s5726_s13 = inlined_call_operand.vmem [shape: f32[2,1,256], index: 13, kind: output, shape index: {1}]  }
   0x1   :  { %5750 = sst [smem:[#allocation31_spill]] %s5713_s0 }
   0x2   :  { %5751 = sst [smem:[#allocation32_spill]] %s5714_s1 }
   0x3   :  { %5752 = sst [smem:[#allocation33_spill]] %s5715_s2 }
   0x4   :  { %5753 = sst [smem:[#allocation34_spill]] %s5716_s3 }
   0x5   :  { %5754 = sst [smem:[#allocation35_spill]] %s5717_s4 }
   0x6   :  { %5755 = sst [smem:[#allocation36_spill]] %s5718_s5 }
   0x7   :  { %5756 = sst [smem:[#allocation37_spill]] %s5719_s6 }
   0x8   :  { %5757 = sst [smem:[#allocation38_spill]] %s5720_s7 }
   0x9   :  { %5758 = sst [smem:[#allocation39_spill]] %s5721_s8 }
   0xa   :  { %5759 = sst [smem:[#allocation40_spill]] %s5722_s9 }
   0xb   :  { %5760 = sst [smem:[#allocation41_spill]] %s5723_s10 }
   0xc   :  { %5761 = sst [smem:[#allocation42_spill]] %s5724_s11 }
   0xd   :  { %5762 = sst [smem:[#allocation43_spill]] %s5725_s12 }
   0xe   :  { %5763 = sst [smem:[#allocation44_spill]] %s5726_s13 }
   0xf   :  { %19 = vsyncpa [#allocation11], 0 }
  0x10   :  { %21 = vsyncpa [#allocation11 + $0x1], 0  ;;  %s4535_s25 = smov 0   ;;  %s4537_s26 = smov 0  }
  0x11   :  { %s4539_s27 = smov 0   ;;  %s4541_s28 = smov 0  }
  0x12   :  { %s4543_s29 = smov 0   ;;  %s4545_s30 = smov 0  }
  0x13   :  { %s4547_s14 = smov 0   ;;  %s4549_s15 = smov 0  }
  0x14   :  { %s4551_s16 = smov 0   ;;  %s4553_s17 = smov 0  }
  0x15   :  { %s4555_s18 = smov 0   ;;  %s4557_s19 = smov 0  }
  0x16   :  { %s4559_s20 = smov 0   ;;  %s4561_s21 = smov 0  }
  0x17   :  { %s4563_s22 = smov 0   ;;  %s4565_s23 = smov 0  }
  0x18 LB: > { %5764 = sst [smem:[#allocation13_spill]] %s4406_s28  ;;  %s39_s11 = sadd.s32 1, %s4442_s20  ;;  %s4454_s23 = sphi %s4565_s23, %s27_s23   ;;  %s4450_s22 = sphi %s4563_s22, %s5850_s22   ;;  %s4446_s21 = sphi %s4561_s21, %s5849_s21   ;;  %s4442_s20 = sphi %s4559_s20, %s5848_s20   ;;  %s4438_s19 = sphi %s4557_s19, %s5847_s19   ;;  %s4434_s18 = sphi %s4555_s18, %s5846_s18   ;;  %s4430_s17 = sphi %s4553_s17, %s5845_s17   ;;  %s4426_s16 = sphi %s4551_s16, %s5844_s16   ;;  %s4422_s15 = sphi %s4549_s15, %s5843_s15   ;;  %s4418_s14 = sphi %s4547_s14, %s5842_s14   ;;  %s4414_s30 = sphi %s4545_s30, %s5841_s30   ;;  %s4410_s29 = sphi %s4543_s29, %s5840_s29   ;;  %s4406_s28 = sphi %s4541_s28, %s5839_s28   ;;  %s4402_s27 = sphi %s4539_s27, %s5838_s27   ;;  %s4398_s26 = sphi %s4537_s26, %s5837_s26   ;;  %s4394_s25 = sphi %s4535_s25, %s5836_s25  }
  0x19   : > { %5765 = sst [smem:[#allocation14_spill]] %s4414_s30  ;;  %s42_s10 = sadd.s32 1, %s4446_s21 }
  0x1a   : > { %5766 = sst [smem:[#allocation15_spill]] %s4430_s17  ;;  %p40_p0 = scmp.ge.s32.totalorder %s39_s11, 2 }
  0x1b   : > { %5767 = sst [smem:[#allocation16_spill]] %s4434_s18  ;;  %s46_s9 = sadd.s32 1, %s4450_s22 }
  0x1c   : > { %5768 = sst [smem:[#allocation17_spill]] %s4438_s19  ;;  %s55_s8 = sadd.s32 1, %s4426_s16 }
  0x1d   : > { %p62_p1 = scmp.ne.s32.totalorder %s4426_s16, %s4422_s15  ;;  %s5852_s11 = smov (%p40_p0, %s39_s11), 0 }
  0x1e   : > { %5769 = sst [smem:[#allocation18_spill]] %s5852_s11  ;;  %s5854_s10 = smov (!%p40_p0, %s42_s10), %s4446_s21 }
  0x1f   : > { %p63_p2 = scmp.eq.s32.totalorder %s4454_s23, 0  ;;  %s79_s12 = ssub.s32 %s4442_s20, %s5852_s11 }
  0x20   : > { %p44_p3 = scmp.ge.s32.totalorder %s5854_s10, 2  ;;  %s83_s24 = sadd.s32 1, %s4418_s14 }
  0x21   : > { %p4635_p4 = por %p63_p2, %p62_p1  ;;  %p90_p5 = scmp.ne.s32.totalorder %s4418_s14, %s4414_s30 }
  0x22   : > { %s5856_s10 = smov (%p44_p3, %s5854_s10), 0  ;;  %s5858_s9 = smov (!%p44_p3, %s46_s9), %s4450_s22 }
  0x23   : > { %5771 = sst [smem:[#allocation19_spill]] %s5856_s10  ;;  %s51_s7 = ssub.s32 %s4446_s21, %s5856_s10 }
  0x24   : > { %p4648_p6 = por %p90_p5, %p63_p2  ;;  %p48_p7 = scmp.ge.s32.totalorder %s5858_s9, 2 }
  0x25   : > { %p107_p8 = scmp.eq.s32.totalorder %s51_s7, 0  ;;  %s109_s4 = sadd.s32 1, %s4410_s29 }
  0x26   : > { %p116_p9 = scmp.ne.s32.totalorder %s4410_s29, %s4406_s28  ;;  %s5860_s9 = smov (%p48_p7, %s5858_s9), 0 }
  0x27   : > { %5773 = sst [smem:[#allocation20_spill]] %s5860_s9  ;;  %s50_s5 = ssub.s32 %s4450_s22, %s5860_s9 }
  0x28   : > { %s4658_s10 = scalar_select %p107_p8, %s4410_s29, %s109_s4  }
  0x29   : > { %p4664_p10 = por %p116_p9, %p63_p2  ;;  %s52_s13 = sor.u32 %s51_s7, %s50_s5 }
  0x2a   : > { %5774 = sst [smem:[#allocation21_spill]] %s4658_s10  ;;  %s80_s18 = sor.u32 %s79_s12, %s50_s5 }
  0x2b   : > { %p53_p11 = scmp.eq.s32.totalorder %s52_s13, 0  ;;  %p81_p12 = scmp.eq.s32.totalorder %s80_s18, 0 }
  0x2c   : > { %p133_p13 = scmp.eq.s32.totalorder %s79_s12, 0  ;;  %s135_s19 = sadd.s32 1, %s4402_s27 }
  0x2d   : > { %s4670_s28 = scalar_select %p53_p11, %s4426_s16, %s55_s8  }
  0x2e   : > { %s4673_s30 = scalar_select %p81_p12, %s4418_s14, %s83_s24  }
  0x2f   : > { %5776 = sst [smem:[#allocation22_spill]] %s4670_s28  ;;  %p142_p0 = scmp.ne.s32.totalorder %s4402_s27, %s4398_s26 }
  0x30   : > { %5777 = sst [smem:[#allocation23_spill]] %s4673_s30  ;;  %s5778_s9 = sadd.s32 4294967295, %s4454_s23  }
  0x31   : > { %s4676_s4 = scalar_select %p133_p13, %s4402_s27, %s135_s19  }
  0x32   : > { %p342_p3 = scmp.eq.s32.totalorder %s5778_s9, 7  ;;  %p347_p5 = scmp.ne.s32.totalorder %s4422_s15, %s4394_s25 }
  0x33   : > { %s5779_s10 = sadd.s32 4294967294, %s4454_s23   ;;  %p4688_p8 = por %p142_p0, %p63_p2 }
  0x34   : > { %p348_p7 = scmp.eq.s32.totalorder %s5779_s10, 7  ;;  %p4695_p9 = por %p342_p3, %p62_p1 }
  0x35   : > { %p3382_p12 = scmp.ge.s32.totalorder %s4454_s23, 8 }
  0x36   : > { %p4699_p11 = por %p348_p7, %p347_p5 }
  0x37   : > { %416 = sbr.rel (%p3382_p12) target bundleno = 106 (0x6a), region = 48 }
  0x3c   : > { %419 = sbr.rel (!%p4635_p4) target bundleno = 72 (0x48), region = 52  ;;  %s421_s9 = sand.u32 (%p4635_p4), 1, %s4426_s16  }
  0x3d   : > { %s3384_s10 = sshll.u32 (%p4635_p4), %s4450_s22, 3  ;;  %s3383_s12 = sshll.u32 (%p4635_p4), %s421_s9, 5 }
  0x3e   : > { %s425_s13 = sadd.s32 (%p4635_p4), %s4446_s21, %s3384_s10  ;;  %s5783_s0 = sld [smem:[#allocation31_spill]] (%p4635_p4) }
  0x3f   : > { %s3385_s18 = sshll.u32 (%p4635_p4), %s425_s13, 3  ;;  %s423_s30 = scalar_lea.vmem (%p4635_p4), [#allocation6], %s3383_s12 }
  0x44   : > { %s427_s28 = scalar_lea.vmem %s5783_s0, %s3385_s18 }
  0x45   : > { %v462_v0 = vld [vmem:[%s427_s28] sm:$0xff]  ;;  %v464_v1 = vld [vmem:[%s427_s28 + $0x10] sm:$0xff] }
  0x46   : > { %v466_v2 = vld [vmem:[%s427_s28 + $0x20] sm:$0xff]  ;;  %463 = vst [vmem:[%s423_s30] sm:$0xff] %v462_v0  ;;  %465 = vst [vmem:[%s423_s30 + $0x8] sm:$0xff] %v464_v1  ;;  %v468_v3 = vld [vmem:[%s427_s28 + $0x30] sm:$0xff] }
  0x47   : > { %467 = vst [vmem:[%s423_s30 + $0x10] sm:$0xff] %v466_v2  ;;  %469 = vst [vmem:[%s423_s30 + $0x18] sm:$0xff] %v468_v3 }
  0x48 PF: > { %475 = sbr.rel (!%p4648_p6) target bundleno = 84 (0x54), region = 90  ;;  %s477_s6 = sand.u32 (%p4648_p6), 1, %s4418_s14  }
  0x49   : > { %s3387_s9 = sshll.u32 (%p4648_p6), %s4450_s22, 3  ;;  %s3386_s10 = sshll.u32 (%p4648_p6), %s477_s6, 5 }
  0x4a   : > { %s481_s13 = sadd.s32 (%p4648_p6), %s4442_s20, %s3387_s9  ;;  %s5784_s1 = sld [smem:[#allocation32_spill]] (%p4648_p6) }
  0x4b   : > { %s3388_s18 = sshll.u32 (%p4648_p6), %s481_s13, 3  ;;  %s479_s28 = scalar_lea.vmem (%p4648_p6), [#allocation7], %s3386_s10 }
  0x50   : > { %s483_s12 = scalar_lea.vmem %s5784_s1, %s3388_s18 }
  0x51   : > { %v518_v4 = vld [vmem:[%s483_s12] sm:$0xff]  ;;  %v520_v5 = vld [vmem:[%s483_s12 + $0x10] sm:$0xff] }
  0x52   : > { %v522_v6 = vld [vmem:[%s483_s12 + $0x20] sm:$0xff]  ;;  %519 = vst [vmem:[%s479_s28] sm:$0xff] %v518_v4  ;;  %521 = vst [vmem:[%s479_s28 + $0x8] sm:$0xff] %v520_v5  ;;  %v524_v7 = vld [vmem:[%s483_s12 + $0x30] sm:$0xff] }
  0x53   : > { %523 = vst [vmem:[%s479_s28 + $0x10] sm:$0xff] %v522_v6  ;;  %525 = vst [vmem:[%s479_s28 + $0x18] sm:$0xff] %v524_v7 }
  0x54 PF: > { %531 = sbr.rel (!%p4664_p10) target bundleno = 95 (0x5f), region = 128  ;;  %s533_s11 = sand.u32 (%p4664_p10), 1, %s4410_s29  }
  0x55   : > { %s3390_s30 = sshll.u32 (%p4664_p10), %s4446_s21, 3  ;;  %s3389_s6 = sshll.u32 (%p4664_p10), %s533_s11, 4 }
  0x56   : > { %s5785_s2 = sld [smem:[#allocation33_spill]] (%p4664_p10)  ;;  %s535_s10 = scalar_lea.vmem (%p4664_p10), [#allocation8], %s3389_s6 }
  0x5c   : > { %s537_s18 = scalar_lea.vmem %s5785_s2, %s3390_s30 }
  0x5d   : > { %v568_v8 = vld [vmem:[%s537_s18] sm:$0xff]  ;;  %v570_v9 = vld [vmem:[%s537_s18 + $0x10] sm:$0xff] }
  0x5e   : > { %569 = vst [vmem:[%s535_s10] sm:$0xff] %v568_v8  ;;  %571 = vst [vmem:[%s535_s10 + $0x8] sm:$0xff] %v570_v9 }
  0x5f PF: > { %577 = sbr.rel (!%p4688_p8) target bundleno = 106 (0x6a), region = 166  ;;  %s579_s17 = sand.u32 (%p4688_p8), 1, %s4402_s27  }
  0x60   : > { %s3392_s19 = sshll.u32 (%p4688_p8), %s4442_s20, 3  ;;  %s3391_s24 = sshll.u32 (%p4688_p8), %s579_s17, 4 }
  0x61   : > { %s5786_s3 = sld [smem:[#allocation34_spill]] (%p4688_p8)  ;;  %s581_s30 = scalar_lea.vmem (%p4688_p8), [#allocation9], %s3391_s24 }
  0x67   : > { %s583_s11 = scalar_lea.vmem %s5786_s3, %s3392_s19 }
  0x68   : > { %v614_v10 = vld [vmem:[%s583_s11] sm:$0xff]  ;;  %v616_v11 = vld [vmem:[%s583_s11 + $0x10] sm:$0xff] }
  0x69   : > { %615 = vst [vmem:[%s581_s30] sm:$0xff] %v614_v10  ;;  %617 = vst [vmem:[%s581_s30 + $0x8] sm:$0xff] %v616_v11 }
  0x6a PF: > { %p3393_p1 = scmp.ge.s32.totalorder %s4454_s23, 1  ;;  %p622_p2 = scmp.lt.s32.totalorder %s4454_s23, 9 }
  0x6c   : > { %p623_p4 = pnand %p3393_p1, %p622_p2 }
  0x6e   : > { %626 = sbr.rel (%p623_p4) target bundleno = 1633 (0x661), region = 204 }
  0x73   : > { %s5787_s7 = sld [smem:[#allocation14_spill]]  ;;  %s5743_s18 = sand.u32 1, %s4422_s15  }
  0x74   : > { %s5788_s6 = sld [smem:[#allocation13_spill]]  ;;  %s3394_s17 = sshll.u32 %s5743_s18, 5 }
  0x75   : > { %s5789_s9 = sld [smem:[#allocation17_spill]]  ;;  %s650_s12 = sand.u32 1, %s4398_s26  }
  0x76   : > { %s5790_s13 = sld [smem:[#allocation16_spill]]  ;;  %s4742_s11 = sshll.u32 %s650_s12, 4 }
  0x77   : > { %s4754_s18 = scalar_lea.vmem [#allocation6], %s3394_s17  ;;  %s5792_s12 = sld [smem:[#allocation15_spill]] }
  0x79   : > { %s636_s10 = sand.u32 1, %s5787_s7  }
  0x7a   : > { %s3395_s19 = sshll.u32 %s636_s10, 5  ;;  %s643_s24 = sand.u32 1, %s5788_s6  }
  0x7b   : > { %s3396_s28 = sshll.u32 %s643_s24, 4  ;;  %p712_p6 = scmp.lt.s32.totalorder %s5789_s9, 1 }
  0x7c   : > { %p714_p10 = scmp.lt.s32.totalorder %s5790_s13, 1  ;;  %s4756_s6 = scalar_lea.vmem [#allocation7], %s3395_s19 }
  0x7d   : > { %s5862_s9 = smov (!%p712_p6, %s5789_s9), 1  ;;  %s645_s26 = scalar_lea.vmem [#allocation8], %s3396_s28 }
  0x7e   : > { %s5864_s13 = smov (!%p714_p10, %s5790_s13), 1  ;;  %s3399_s30 = sshll.u32 %s5862_s9, 1 }
  0x7f   : > { %s4748_s0 = sadd.s32 %s3399_s30, %s5864_s13  ;;  %s652_s10 = scalar_lea.vmem [#allocation9], %s4742_s11 }
  0x80   : > { %s4759_s24 = scalar_lea.vmem [#allocation10], %s3394_s17  ;;  %p3400_p13 = scmp.ne.s32.totalorder %s5792_s12, 0 }
  0x81   : > { %s5793_s9 = sld [smem:[#allocation36_spill]] (!%p3400_p13) }
  0x82   : > { %722 = sbr.rel (%p3400_p13) target bundleno = 346 (0x15a), region = 224  ;;  %s5794_s30 = sld [smem:[#allocation35_spill]] (!%p3400_p13) }
  0x87   : > { %v726_v12 = vld [vmem:[%s4754_s18 + $0x18] sm:$0xff]  ;;  %vm750_vm0 = vcmask 1040384   ;;  %v725_v14 = vld [vmem:[%s4754_s18 + $0x10] sm:$0xff]  ;;  %v724_v16 = vld [vmem:[%s4754_s18 + $0x8] sm:$0xff]  ;;  %vm737_vm1 = vcmask 72704   ;;  %vm839_vm2 = vcmask 261120  }
  0x88   : > { %v736_v13 = vld [vmem:[%s645_s26 + $0x8] sm:$0x1]  ;;  %3691 = vmatprep.subr.mxu1 %v726_v12  ;;  %v735_v15 = vld [vmem:[%s645_s26] sm:$0xff]  ;;  %s5795_s7 = smov %s5794_s30  ;;  %v4456_v26 = vmov -inf   ;;  %v4457_v27 = vmov 0.0  }
  0x89   : > { %3681 = vmatprep.subr.msk.mxu0 %vm750_vm0, %v736_v13  ;;  %3692 = vmatpush3.msra.mxu1 %v726_v12  ;;  %v731_v17 = vld [vmem:[%s5793_s9] sm:$0xff]  ;;  %v732_v18 = vld [vmem:[%s5793_s9 + $0x8] sm:$0xff]  ;;  %v733_v21 = vld [vmem:[%s5793_s9 + $0x10] sm:$0xff]  ;;  %941 = vst [vmem:[#allocation3] sm:$0x1] %v4456_v26 }
  0x8a   : > { %3682 = vmatpush3.msk.msra.mxu0 %vm750_vm0, %v736_v13  ;;  %3693 = vmatprep.subr.mxu1 %v725_v14  ;;  %v723_v19 = vld [vmem:[%s4754_s18] sm:$0xff]  ;;  %v727_v20 = vld [vmem:[%s5794_s30] sm:$0xff]  ;;  %v734_v23 = vld [vmem:[%s5793_s9 + $0x18] sm:$0xff]  ;;  %942 = vst [vmem:[#allocation3 + $0x1] sm:$0x1] %v4456_v26 }
  0x8b   : > { %3683 = vmatprep.subr.mxu0 %v735_v15  ;;  %3694 = vmatpush3.msra.mxu1 %v725_v14  ;;  %v728_v22 = vld [vmem:[%s5795_s7 + $0x8] sm:$0xff]  ;;  %v729_v24 = vld [vmem:[%s5795_s7 + $0x10] sm:$0xff]  ;;  %v730_v25 = vld [vmem:[%s5795_s7 + $0x18] sm:$0xff]  ;;  %943 = vst [vmem:[#allocation3 + $0x2] sm:$0x1] %v4456_v26 }
  0x8c   : > { %3684 = vmatpush3.msra.mxu0 %v735_v15  ;;  %3695 = vmatprep.subr.mxu1 %v724_v16  ;;  %944 = vst [vmem:[#allocation3 + $0x3] sm:$0x1] %v4456_v26  ;;  %945 = vst [vmem:[#allocation4] sm:$0x1] %v4457_v27 }
  0x8d   : > { %3685 = vmatprep.mubr.msk.f32.mxu0 %vm737_vm1, %v731_v17  ;;  %3696 = vmatpush3.msra.mxu1 %v724_v16  ;;  %946 = vst [vmem:[#allocation4 + $0x1] sm:$0x1] %v4457_v27  ;;  %947 = vst [vmem:[#allocation4 + $0x2] sm:$0x1] %v4457_v27 }
  0x8e   : > { %3686 = vmatmul.mubr.msk.f32.vlgmr.msra.gmra.mxu0 %vm737_vm1, %v732_v18  ;;  %3697 = vmatprep.subr.mxu1 %v723_v19  ;;  %948 = vst [vmem:[#allocation4 + $0x3] sm:$0x1] %v4457_v27  ;;  %949 = vst [vmem:[#allocation5] sm:$0xff] %v4457_v27 }
  0x8f   : > { %3699 = vmatprep.mubr.msk.f32.mxu1 %vm839_vm2, %v727_v20  ;;  %3698 = vmatpush3.msra.mxu1 %v723_v19  ;;  %950 = vst [vmem:[#allocation5 + $0x18] sm:$0xff] %v4457_v27  ;;  %951 = vst [vmem:[#allocation5 + $0x8] sm:$0xff] %v4457_v27 }
  0x90   : > { %3688 = vmatprep.mubr.msk.f32.mxu0 %vm737_vm1, %v733_v21  ;;  %3700 = vmatmul.mubr.msk.f32.vlgmr.msra.gmra.mxu1 %vm839_vm2, %v728_v22  ;;  %952 = vst [vmem:[#allocation5 + $0x10] sm:$0xff] %v4457_v27 }
  0x91   : > { %3702 = vmatprep.mubr.msk.f32.mxu1 %vm839_vm2, %v729_v24 }
  0x92   : > { %3689 = vmatmul.mubr.msk.f32.gmra.mxu0 %vm737_vm1, %v734_v23 }
  0x94   : > { %3703 = vmatmul.mubr.msk.f32.gmra.mxu1 %vm839_vm2, %v730_v25 }
 0x14e   : > { %v3687_v28 = vpop.f32.mrf.mxu0 }
 0x150   : > { %v820_v29 = vpop.f32.mrf.mxu0  ;;  %v3701_v30 = vpop.f32.mrf.mxu1 }
 0x151   : > { %v924_v31 = vadd.f32 %v3701_v30, %v3687_v28 }
 0x152   : > { %v3690_v32 = vpop.f32.mrf.mxu0  ;;  %v918_v33 = vpop.f32.mrf.mxu1 }
 0x153   : > { %938 = vst [vmem:[#allocation2] sm:$0xff] %v924_v31  ;;  %v919_v34 = vadd.f32 %v918_v33, %v820_v29 }
 0x154   : > { %v3704_v35 = vpop.f32.mrf.mxu1  ;;  %v830_v37 = vpop.f32.mrf.mxu0 }
 0x155   : > { %937 = vst [vmem:[#allocation2 + $0x10] sm:$0xff] %v919_v34  ;;  %v934_v36 = vadd.f32 %v3704_v35, %v3690_v32 }
 0x156   : > { %v928_v38 = vpop.f32.mrf.mxu1 }
 0x157   : > { %940 = vst [vmem:[#allocation2 + $0x8] sm:$0xff] %v934_v36  ;;  %v929_v39 = vadd.f32 %v928_v38, %v830_v37 }
 0x159   : > { %939 = vst [vmem:[#allocation2 + $0x18] sm:$0xff] %v929_v39 }
 0x15a PF: > { %v956_v40 = vld [vmem:[%s4756_s6 + $0x18] sm:$0xff]  ;;  %vm1000_vm3 = vcmask 1040384   ;;  %v955_v42 = vld [vmem:[%s4756_s6 + $0x10] sm:$0xff]  ;;  %v954_v44 = vld [vmem:[%s4756_s6 + $0x8] sm:$0xff]  ;;  %s5796_s2 = sld [smem:[#allocation38_spill]]  ;;  %vm975_vm4 = vcmask 72704  }
 0x15b   : > { %v974_v41 = vld [vmem:[%s652_s10 + $0x8] sm:$0x1]  ;;  %3721 = vmatprep.subr.mxu1 %v956_v40  ;;  %v973_v43 = vld [vmem:[%s652_s10] sm:$0xff]  ;;  %s5797_s19 = sld [smem:[#allocation37_spill]]  ;;  %vm1109_vm5 = vcmask 261120   ;;  %vm1275_vm6 = vcmask 64512  }
 0x15c   : > { %3705 = vmatprep.subr.msk.mxu0 %vm1000_vm3, %v974_v41  ;;  %3722 = vmatpush3.msra.mxu1 %v956_v40  ;;  %v953_v47 = vld [vmem:[%s4756_s6] sm:$0xff]  ;;  %v1239_v63 = vld [vmem:[#allocation2 + $0x10] sm:$0xff]  ;;  %v1240_v11 = vld [vmem:[#allocation2] sm:$0xff]  ;;  %vm4459_vm7 = vmmov 0   ;;  %s5813_s6 = sld [smem:[#allocation15_spill]] }
 0x15d   : > { %3706 = vmatpush3.msk.msra.mxu0 %vm1000_vm3, %v974_v41  ;;  %3723 = vmatprep.subr.mxu1 %v955_v42 }
 0x15e   : > { %3707 = vmatprep.subr.mxu0 %v973_v43  ;;  %3724 = vmatpush3.msra.mxu1 %v955_v42  ;;  %v1242_v13 = vld [vmem:[#allocation2 + $0x8] sm:$0xff] }
 0x15f   : > { %3708 = vmatpush3.msra.mxu0 %v973_v43  ;;  %3725 = vmatprep.subr.mxu1 %v954_v44 }
 0x160   : > { %v965_v45 = vld [vmem:[%s5796_s2] sm:$0xff]  ;;  %v966_v46 = vld [vmem:[%s5796_s2 + $0x8] sm:$0xff]  ;;  %v967_v49 = vld [vmem:[%s5796_s2 + $0x10] sm:$0xff]  ;;  %3726 = vmatpush3.msra.mxu1 %v954_v44  ;;  %3741 = vmatprep.subr.mxu0 %v1239_v63 }
 0x161   : > { %s5798_s3 = smov %s5797_s19  ;;  %v957_v48 = vld [vmem:[%s5797_s19] sm:$0xff]  ;;  %3709 = vmatprep.mubr.msk.f32.mxu0 %vm975_vm4, %v965_v45  ;;  %3727 = vmatprep.subr.mxu1 %v953_v47  ;;  %v968_v52 = vld [vmem:[%s5796_s2 + $0x18] sm:$0xff]  ;;  %v970_v55 = vld [vmem:[%s5796_s2 + $0x28] sm:$0xff] }
 0x162   : > { %3710 = vmatmul.mubr.msk.f32.vlgmr.msra.gmra.mxu0 %vm975_vm4, %v966_v46  ;;  %v958_v50 = vld [vmem:[%s5798_s3 + $0x8] sm:$0xff]  ;;  %3729 = vmatprep.mubr.msk.f32.mxu1 %vm1109_vm5, %v957_v48  ;;  %v959_v51 = vld [vmem:[%s5798_s3 + $0x10] sm:$0xff]  ;;  %v960_v53 = vld [vmem:[%s5798_s3 + $0x18] sm:$0xff]  ;;  %p3491_p0 = scmp.ne.s32.totalorder %s5813_s6, 1 }
 0x163   : > { %3728 = vmatpush3.msra.mxu1 %v953_v47  ;;  %3712 = vmatprep.mubr.msk.f32.mxu0 %vm975_vm4, %v967_v49  ;;  %v969_v54 = vld [vmem:[%s5796_s2 + $0x20] sm:$0xff]  ;;  %v971_v56 = vld [vmem:[%s5796_s2 + $0x30] sm:$0xff]  ;;  %v972_v57 = vld [vmem:[%s5796_s2 + $0x38] sm:$0xff]  ;;  %s5814_s17 = sld [smem:[#allocation39_spill]] (!%p3491_p0) }
 0x164   : > { %3730 = vmatmul.mubr.msk.f32.vlgmr.msra.gmra.mxu1 %vm1109_vm5, %v958_v50  ;;  %3742 = vmatpush3.msra.mxu0 %v1239_v63  ;;  %v961_v5 = vld [vmem:[%s5798_s3 + $0x20] sm:$0xff]  ;;  %v962_v6 = vld [vmem:[%s5798_s3 + $0x28] sm:$0xff]  ;;  %v963_v7 = vld [vmem:[%s5798_s3 + $0x30] sm:$0xff]  ;;  %s5816_s26 = sld [smem:[#allocation40_spill]] (!%p3491_p0) }
 0x165   : > { %3732 = vmatprep.mubr.msk.f32.mxu1 %vm1109_vm5, %v959_v51  ;;  %v1241_v8 = vld [vmem:[#allocation2 + $0x18] sm:$0xff]  ;;  %3767 = vmatprep.subr.mxu1 %v1240_v11  ;;  %s5818_s28 = sld [smem:[#allocation41_spill]] (!%p3491_p0) }
 0x166   : > { %3713 = vmatmul.mubr.msk.f32.gmra.mxu0 %vm975_vm4, %v968_v52  ;;  %v964_v9 = vld [vmem:[%s5798_s3 + $0x38] sm:$0xff]  ;;  %3793 = vmatprep.subr.mxu0 %v1241_v8 }
 0x167   : > { %3715 = vmatprep.mubr.msk.f32.mxu0 %vm975_vm4, %v969_v54  ;;  %3768 = vmatpush3.msra.mxu1 %v1240_v11 }
 0x168   : > { %3733 = vmatmul.mubr.msk.f32.gmra.mxu1 %vm1109_vm5, %v960_v53  ;;  %3819 = vmatprep.subr.mxu1 %v1242_v13 }
 0x169   : > { %3735 = vmatprep.mubr.msk.f32.mxu1 %vm1109_vm5, %v961_v5  ;;  %s5815_s11 = smov (!%p3491_p0), %s5814_s17 }
 0x16a   : > { %3716 = vmatmul.mubr.msk.f32.gmra.mxu0 %vm975_vm4, %v970_v55  ;;  %s5817_s12 = smov (!%p3491_p0), %s5816_s26 }
 0x16b   : > { %3718 = vmatprep.mubr.msk.f32.mxu0 %vm975_vm4, %v971_v56  ;;  %s5819_s7 = smov (!%p3491_p0), %s5818_s28 }
 0x16c   : > { %3736 = vmatmul.mubr.msk.f32.gmra.mxu1 %vm1109_vm5, %v962_v6 }
 0x16d   : > { %3738 = vmatprep.mubr.msk.f32.mxu1 %vm1109_vm5, %v963_v7 }
 0x16e   : > { %3719 = vmatmul.mubr.msk.f32.gmra.mxu0 %vm975_vm4, %v972_v57 }
 0x170   : > { %3739 = vmatmul.mubr.msk.f32.gmra.mxu1 %vm1109_vm5, %v964_v9 }
 0x222   : > { %v3711_v58 = vpop.f32.mrf.mxu0 }
 0x224   : > { %v1070_v59 = vpop.f32.mrf.mxu0  ;;  %v3731_v60 = vpop.f32.mrf.mxu1 }
 0x225   : > { %v1206_v10 = vadd.f32 %v3731_v60, %v3711_v58 }
 0x226   : > { %v3714_v61 = vpop.f32.mrf.mxu0  ;;  %v1200_v62 = vpop.f32.mrf.mxu1 }
 0x227   : > { %v1201_v0 = vadd.f32 %v1200_v62, %v1070_v59 }
 0x228   : > { %v3734_v1 = vpop.f32.mrf.mxu1  ;;  %v1080_v2 = vpop.f32.mrf.mxu0 }
 0x229   : > { %1243 = vxpose.xlu0.b32.start.end [1/1] (short) %v1201_v0, 128  ;;  %v1216_v12 = vadd.f32 %v3734_v1, %v3714_v61 }
 0x22a   : > { %v1210_v3 = vpop.f32.mrf.mxu1 }
 0x22b   : > { %v1211_v4 = vadd.f32 %v1210_v3, %v1080_v2 }
 0x22d   : > { %1694 = vxpose.xlu1.b32.start.end [1/1] (short) %v1211_v4, 128 }
 0x266   : > { %1469 = vxpose.xlu0.b32.start.end [1/1] (short) %v1206_v10, 128 }
 0x26a   : > { %1919 = vxpose.xlu1.b32.start.end [1/1] (short) %v1216_v12, 128 }
 0x2a5   : > { %v1259_v14 = vpop.trf.xlu0 }
 0x2a6   : > { %3743 = vmatprep.mubr.msk.f32.mxu0 %vm1275_vm6, %v1259_v14  ;;  %v4936_v14 = vpop.f32.mrf.mxu0 }
 0x2a7   : > { %5799 = vst [vmem:[#allocation24_spill] sm:$0xff] %v4936_v14 }
 0x2a9   : > { %v1260_v15 = vpop.trf.xlu0  ;;  %v1710_v16 = vpop.trf.xlu1 }
 0x2aa   : > { %3744 = vmatmul.mubr.msk.f32.vlgmr.msra.gmra.mxu0 %vm1275_vm6, %v1260_v15  ;;  %v4458_v15 = vmov 0.0  }
 0x2ab   : > { %3794 = vmatpush3.msra.mxu0 %v1241_v8 }
 0x2ac   : > { %3845 = vmatprep.subr.mxu0 %v4458_v15 }
 0x2ad   : > { %v1261_v17 = vpop.trf.xlu0  ;;  %v1711_v18 = vpop.trf.xlu1 }
 0x2ae   : > { %3746 = vmatprep.mubr.msk.f32.mxu0 %vm1275_vm6, %v1261_v17 }
 0x2b1   : > { %v1262_v19 = vpop.trf.xlu0  ;;  %v1712_v20 = vpop.trf.xlu1 }
 0x2b2   : > { %3747 = vmatmul.mubr.msk.f32.gmra.mxu0 %vm1275_vm6, %v1262_v19 }
 0x2b5   : > { %v1263_v21 = vpop.trf.xlu0  ;;  %v1713_v22 = vpop.trf.xlu1 }
 0x2b6   : > { %3749 = vmatprep.mubr.msk.f32.mxu0 %vm1275_vm6, %v1263_v21 }
 0x2b9   : > { %v1264_v23 = vpop.trf.xlu0  ;;  %v1714_v24 = vpop.trf.xlu1 }
 0x2ba   : > { %3750 = vmatmul.mubr.msk.f32.gmra.mxu0 %vm1275_vm6, %v1264_v23 }
 0x2bd   : > { %v1265_v25 = vpop.trf.xlu0  ;;  %v1715_v26 = vpop.trf.xlu1 }
 0x2be   : > { %3752 = vmatprep.mubr.msk.f32.mxu0 %vm1275_vm6, %v1265_v25 }
 0x2c1   : > { %v1266_v27 = vpop.trf.xlu0  ;;  %v1716_v28 = vpop.trf.xlu1 }
 0x2c2   : > { %3753 = vmatmul.mubr.msk.f32.gmra.mxu0 %vm1275_vm6, %v1266_v27 }
 0x2c5   : > { %v1267_v29 = vpop.trf.xlu0  ;;  %v1717_v30 = vpop.trf.xlu1 }
 0x2c6   : > { %3755 = vmatprep.mubr.msk.f32.mxu0 %vm1275_vm6, %v1267_v29 }
 0x2c9   : > { %v1268_v31 = vpop.trf.xlu0  ;;  %v1718_v32 = vpop.trf.xlu1 }
 0x2ca   : > { %3756 = vmatmul.mubr.msk.f32.gmra.mxu0 %vm1275_vm6, %v1268_v31 }
 0x2cd   : > { %v1269_v33 = vpop.trf.xlu0  ;;  %v1719_v34 = vpop.trf.xlu1 }
 0x2ce   : > { %3758 = vmatprep.mubr.msk.f32.mxu0 %vm1275_vm6, %v1269_v33 }
 0x2d1   : > { %v1270_v35 = vpop.trf.xlu0  ;;  %v1720_v36 = vpop.trf.xlu1 }
 0x2d2   : > { %3759 = vmatmul.mubr.msk.f32.gmra.mxu0 %vm1275_vm6, %v1270_v35 }
 0x2d5   : > { %v1271_v37 = vpop.trf.xlu0  ;;  %v1721_v38 = vpop.trf.xlu1 }
 0x2d6   : > { %3761 = vmatprep.mubr.msk.f32.mxu0 %vm1275_vm6, %v1271_v37 }
 0x2d9   : > { %v1272_v39 = vpop.trf.xlu0  ;;  %v1722_v40 = vpop.trf.xlu1 }
 0x2da   : > { %3762 = vmatmul.mubr.msk.f32.gmra.mxu0 %vm1275_vm6, %v1272_v39 }
 0x2dd   : > { %v1273_v41 = vpop.trf.xlu0  ;;  %v1723_v42 = vpop.trf.xlu1 }
 0x2de   : > { %3764 = vmatprep.mubr.msk.f32.mxu0 %vm1275_vm6, %v1273_v41 }
 0x2e1   : > { %v1274_v43 = vpop.trf.xlu0  ;;  %v1724_v44 = vpop.trf.xlu1 }
 0x2e2   : > { %3765 = vmatmul.mubr.msk.f32.gmra.mxu0 %vm1275_vm6, %v1274_v43 }
 0x2e3   : > { %3795 = vmatprep.mubr.msk.f32.mxu0 %vm1275_vm6, %v1710_v16  ;;  %v4940_v16 = vpop.f32.mrf.mxu0 }
 0x2e5   : > { %v1485_v45 = vpop.trf.xlu0  ;;  %v1725_v46 = vpop.trf.xlu1 }
 0x2e6   : > { %3769 = vmatprep.mubr.msk.f32.mxu1 %vm1275_vm6, %v1485_v45  ;;  %3796 = vmatmul.mubr.msk.f32.vlgmr.msra.gmra.mxu0 %vm1275_vm6, %v1711_v18  ;;  %v4942_v17 = vpop.f32.mrf.mxu0 }
 0x2e7   : > { %3798 = vmatprep.mubr.msk.f32.mxu0 %vm1275_vm6, %v1712_v20  ;;  %5800 = vst [vmem:[#allocation25_spill] sm:$0xff] %v4942_v17 }
 0x2e8   : > { %v4944_v18 = vpop.f32.mrf.mxu0 }
 0x2e9   : > { %v1486_v47 = vpop.trf.xlu0  ;;  %v1935_v48 = vpop.trf.xlu1  ;;  %5801 = vst [vmem:[#allocation26_spill] sm:$0xff] %v4944_v18 }
 0x2ea   : > { %3770 = vmatmul.mubr.msk.f32.vlgmr.msra.gmra.mxu1 %vm1275_vm6, %v1486_v47  ;;  %3799 = vmatmul.mubr.msk.f32.gmra.mxu0 %vm1275_vm6, %v1713_v22 }
 0x2eb   : > { %3801 = vmatprep.mubr.msk.f32.mxu0 %vm1275_vm6, %v1714_v24  ;;  %3820 = vmatpush3.msra.mxu1 %v1242_v13 }
 0x2ec   : > { %3880 = vmatprep.subr.mxu1 %v4458_v15 }
 0x2ed   : > { %v1487_v49 = vpop.trf.xlu0  ;;  %v1936_v50 = vpop.trf.xlu1 }
 0x2ee   : > { %3772 = vmatprep.mubr.msk.f32.mxu1 %vm1275_vm6, %v1487_v49  ;;  %3802 = vmatmul.mubr.msk.f32.gmra.mxu0 %vm1275_vm6, %v1715_v26 }
 0x2ef   : > { %3804 = vmatprep.mubr.msk.f32.mxu0 %vm1275_vm6, %v1716_v28 }
 0x2f1   : > { %v1488_v51 = vpop.trf.xlu0  ;;  %v1937_v52 = vpop.trf.xlu1 }
 0x2f2   : > { %3773 = vmatmul.mubr.msk.f32.gmra.mxu1 %vm1275_vm6, %v1488_v51  ;;  %3805 = vmatmul.mubr.msk.f32.gmra.mxu0 %vm1275_vm6, %v1717_v30 }
 0x2f3   : > { %3807 = vmatprep.mubr.msk.f32.mxu0 %vm1275_vm6, %v1718_v32 }
 0x2f5   : > { %v1489_v53 = vpop.trf.xlu0  ;;  %v1938_v54 = vpop.trf.xlu1 }
 0x2f6   : > { %3775 = vmatprep.mubr.msk.f32.mxu1 %vm1275_vm6, %v1489_v53  ;;  %3808 = vmatmul.mubr.msk.f32.gmra.mxu0 %vm1275_vm6, %v1719_v34 }
 0x2f7   : > { %3810 = vmatprep.mubr.msk.f32.mxu0 %vm1275_vm6, %v1720_v36 }
 0x2f9   : > { %v1490_v55 = vpop.trf.xlu0  ;;  %v1939_v57 = vpop.trf.xlu1 }
 0x2fa   : > { %3776 = vmatmul.mubr.msk.f32.gmra.mxu1 %vm1275_vm6, %v1490_v55  ;;  %3811 = vmatmul.mubr.msk.f32.gmra.mxu0 %vm1275_vm6, %v1721_v38 }
 0x2fb   : > { %3813 = vmatprep.mubr.msk.f32.mxu0 %vm1275_vm6, %v1722_v40 }
 0x2fd   : > { %v1491_v56 = vpop.trf.xlu0  ;;  %v1940_v59 = vpop.trf.xlu1 }
 0x2fe   : > { %3778 = vmatprep.mubr.msk.f32.mxu1 %vm1275_vm6, %v1491_v56  ;;  %3814 = vmatmul.mubr.msk.f32.gmra.mxu0 %vm1275_vm6, %v1723_v42 }
 0x2ff   : > { %3816 = vmatprep.mubr.msk.f32.mxu0 %vm1275_vm6, %v1724_v44 }
 0x301   : > { %v1492_v58 = vpop.trf.xlu0  ;;  %v1941_v62 = vpop.trf.xlu1 }
 0x302   : > { %3779 = vmatmul.mubr.msk.f32.gmra.mxu1 %vm1275_vm6, %v1492_v58  ;;  %3817 = vmatmul.mubr.msk.f32.gmra.mxu0 %vm1275_vm6, %v1725_v46 }
 0x303   : > { %3877 = vmatprep.mubr.msk.f32.mxu0 %vm4459_vm7, %v4458_v15 }
 0x305   : > { %v1493_v60 = vpop.trf.xlu0  ;;  %v1942_v0 = vpop.trf.xlu1 }
 0x306   : > { %3781 = vmatprep.mubr.msk.f32.mxu1 %vm1275_vm6, %v1493_v60 }
 0x309   : > { %v1494_v61 = vpop.trf.xlu0  ;;  %v1943_v3 = vpop.trf.xlu1 }
 0x30a   : > { %3782 = vmatmul.mubr.msk.f32.gmra.mxu1 %vm1275_vm6, %v1494_v61 }
 0x30d   : > { %v1495_v63 = vpop.trf.xlu0  ;;  %v1944_v5 = vpop.trf.xlu1 }
 0x30e   : > { %3784 = vmatprep.mubr.msk.f32.mxu1 %vm1275_vm6, %v1495_v63 }
 0x311   : > { %v1496_v1 = vpop.trf.xlu0  ;;  %v1945_v8 = vpop.trf.xlu1 }
 0x312   : > { %3785 = vmatmul.mubr.msk.f32.gmra.mxu1 %vm1275_vm6, %v1496_v1 }
 0x315   : > { %v1497_v2 = vpop.trf.xlu0  ;;  %v1946_v9 = vpop.trf.xlu1 }
 0x316   : > { %3787 = vmatprep.mubr.msk.f32.mxu1 %vm1275_vm6, %v1497_v2 }
 0x319   : > { %v1498_v4 = vpop.trf.xlu0  ;;  %v1947_v10 = vpop.trf.xlu1 }
 0x31a   : > { %3788 = vmatmul.mubr.msk.f32.gmra.mxu1 %vm1275_vm6, %v1498_v4 }
 0x31d   : > { %v1499_v6 = vpop.trf.xlu0  ;;  %v1948_v11 = vpop.trf.xlu1 }
 0x31e   : > { %3790 = vmatprep.mubr.msk.f32.mxu1 %vm1275_vm6, %v1499_v6  ;;  %v5021_v6 = vld [vmem:[#allocation3] sm:$0x1] }
 0x321   : > { %v1500_v7 = vpop.trf.xlu0  ;;  %v1949_v12 = vpop.trf.xlu1 }
 0x322   : > { %3791 = vmatmul.mubr.msk.f32.gmra.mxu1 %vm1275_vm6, %v1500_v7 }
 0x323   : > { %3821 = vmatprep.mubr.msk.f32.mxu1 %vm1275_vm6, %v1935_v48 }
 0x325   : > { %v1950_v13 = vpop.trf.xlu1 }
 0x326   : > { %3822 = vmatmul.mubr.msk.f32.vlgmr.msra.gmra.mxu1 %vm1275_vm6, %v1936_v50  ;;  %v4999_v50 = vpop.f32.mrf.mxu1 }
 0x327   : > { %3824 = vmatprep.mubr.msk.f32.mxu1 %vm1275_vm6, %v1937_v52  ;;  %5802 = vst [vmem:[#allocation27_spill] sm:$0xff] %v4999_v50 }
 0x328   : > { %v5006_v55 = vpop.f32.mrf.mxu1 }
 0x32a   : > { %3825 = vmatmul.mubr.msk.f32.gmra.mxu1 %vm1275_vm6, %v1938_v54  ;;  %v5015_v1 = vpop.f32.mrf.mxu1 }
 0x32b   : > { %3827 = vmatprep.mubr.msk.f32.mxu1 %vm1275_vm6, %v1939_v57  ;;  %v2252_v57 = vlaneseq  ;;  %5803 = vst [vmem:[#allocation28_spill] sm:$0xff] %v5015_v1 }
 0x32e   : > { %3828 = vmatmul.mubr.msk.f32.gmra.mxu1 %vm1275_vm6, %v1940_v59 }
 0x32f   : > { %3830 = vmatprep.mubr.msk.f32.mxu1 %vm1275_vm6, %v1941_v62 }
 0x332   : > { %3831 = vmatmul.mubr.msk.f32.gmra.mxu1 %vm1275_vm6, %v1942_v0  ;;  %v2253_v0 = vshrl.u32 %v2252_v57, 7 }
 0x333   : > { %3833 = vmatprep.mubr.msk.f32.mxu1 %vm1275_vm6, %v1943_v3 }
 0x336   : > { %3834 = vmatmul.mubr.msk.f32.gmra.mxu1 %vm1275_vm6, %v1944_v5 }
 0x337   : > { %3836 = vmatprep.mubr.msk.f32.mxu1 %vm1275_vm6, %v1945_v8 }
 0x33a   : > { %3837 = vmatmul.mubr.msk.f32.gmra.mxu1 %vm1275_vm6, %v1946_v9  ;;  %v5025_v9 = vsub.s32 0, %v2253_v0 }
 0x33b   : > { %3839 = vmatprep.mubr.msk.f32.mxu1 %vm1275_vm6, %v1947_v10  ;;  %v5027_v10 = vpop.f32.mrf.mxu1 }
 0x33c   : > { %5804 = vst [vmem:[#allocation29_spill] sm:$0xff] %v5027_v10 }
 0x33e   : > { %3840 = vmatmul.mubr.msk.f32.gmra.mxu1 %vm1275_vm6, %v1948_v11 }
 0x33f   : > { %3842 = vmatprep.mubr.msk.f32.mxu1 %vm1275_vm6, %v1949_v12 }
 0x342   : > { %3843 = vmatmul.mubr.msk.f32.gmra.mxu1 %vm1275_vm6, %v1950_v13 }
 0x343   : > { %3912 = vmatprep.mubr.msk.f32.mxu1 %vm4459_vm7, %v4458_v15 }
 0x36a   : > { %v4946_v19 = vpop.f32.mrf.mxu0 }
 0x36c   : > { %v4948_v20 = vpop.f32.mrf.mxu0 }
 0x36d   : > { %v2148_v23 = vmax.f32 %v4948_v20, %v4946_v19 }
 0x372   : > { %v4950_v21 = vpop.f32.mrf.mxu0 }
 0x374   : > { %v4952_v22 = vpop.f32.mrf.mxu0 }
 0x375   : > { %v2149_v25 = vmax.f32 %v2148_v23, %v4952_v22 }
 0x377   : > { %v2150_v27 = vmax.f32 %v2149_v25, %v4950_v21 }
 0x37a   : > { %v4956_v24 = vpop.f32.mrf.mxu0 }
 0x37c   : > { %v4963_v26 = vpop.f32.mrf.mxu0 }
 0x37d   : > { %v2151_v29 = vmax.f32 %v2150_v27, %v4963_v26 }
 0x37f   : > { %v2152_v31 = vmax.f32 %v2151_v29, %v4956_v24 }
 0x382   : > { %v4966_v28 = vpop.f32.mrf.mxu0 }
 0x384   : > { %v4969_v30 = vpop.f32.mrf.mxu0 }
 0x385   : > { %v2153_v33 = vmax.f32 %v2152_v31, %v4969_v30 }
 0x387   : > { %v2154_v35 = vmax.f32 %v2153_v33, %v4966_v28 }
 0x38a   : > { %v4972_v32 = vpop.f32.mrf.mxu0 }
 0x38c   : > { %v4975_v34 = vpop.f32.mrf.mxu0 }
 0x38d   : > { %v2155_v37 = vmax.f32 %v2154_v35, %v4975_v34 }
 0x38f   : > { %v2156_v39 = vmax.f32 %v2155_v37, %v4972_v32 }
 0x392   : > { %v4978_v36 = vpop.f32.mrf.mxu0 }
 0x394   : > { %v4981_v38 = vpop.f32.mrf.mxu0 }
 0x395   : > { %v2157_v40 = vmax.f32 %v2156_v39, %v4981_v38 }
 0x397   : > { %v2158_v43 = vmax.f32 %v2157_v40, %v4978_v36 }
 0x39a   : > { %v4985_v41 = vpop.f32.mrf.mxu0 }
 0x39c   : > { %v4987_v42 = vpop.f32.mrf.mxu0 }
 0x39d   : > { %v2159_v44 = vmax.f32 %v2158_v43, %v4987_v42 }
 0x39f   : > { %v2160_v46 = vmax.f32 %v2159_v44, %v4985_v41 }
 0x3a2   : > { %v4991_v45 = vpop.f32.mrf.mxu0 }
 0x3a4   : > { %v4994_v47 = vpop.f32.mrf.mxu0 }
 0x3a5   : > { %v2161_v48 = vmax.f32 %v2160_v46, %v4994_v47 }
 0x3a6   : > { %v4997_v49 = vpop.f32.mrf.mxu0 }
 0x3a7   : > { %v2162_v51 = vmax.f32 %v2161_v48, %v4991_v45 }
 0x3a8   : > { %v5002_v52 = vpop.f32.mrf.mxu0 }
 0x3a9   : > { %v2163_v53 = vrot.slane %v2162_v51, 4  ;;  %v2190_v58 = vmax.f32 %v5002_v52, %v4997_v49 }
 0x3aa   : > { %v5004_v54 = vpop.f32.mrf.mxu0  ;;  %v5042_v27 = vpop.f32.mrf.mxu1 }
 0x3ab   : > { %v2164_v56 = vmax.f32 %v2162_v51, %v2163_v53 }
 0x3ac   : > { %v5010_v59 = vpop.f32.mrf.mxu0  ;;  %v5055_v40 = vpop.f32.mrf.mxu1 }
 0x3ad   : > { %v2165_v60 = vrot.slane %v2164_v56, 2  ;;  %v2191_v61 = vmax.f32 %v2190_v58, %v5010_v59 }
 0x3ae   : > { %v5013_v62 = vpop.f32.mrf.mxu0 }
 0x3af   : > { %v2166_v63 = vmax.f32 %v2164_v56, %v2165_v60  ;;  %v2192_v2 = vmax.f32 %v2191_v61, %v5004_v54 }
 0x3b0   : > { %v5018_v3 = vpop.f32.mrf.mxu0 }
 0x3b1   : > { %v2167_v4 = vrot.slane %v2166_v63, 1  ;;  %v2193_v5 = vmax.f32 %v2192_v2, %v5018_v3 }
 0x3b2   : > { %v5023_v7 = vpop.f32.mrf.mxu0 }
 0x3b3   : > { %v2168_v8 = vmax.f32 %v2166_v63, %v2167_v4  ;;  %v2194_v11 = vmax.f32 %v2193_v5, %v5013_v62 }
 0x3b4   : > { %v5030_v12 = vpop.f32.mrf.mxu0 }
 0x3b5   : > { %v5033_v13 = vmax.f32 %v5021_v6, %v2168_v8  ;;  %v2195_v29 = vmax.f32 %v2194_v11, %v5030_v12 }
 0x3b6   : > { %v5035_v23 = vpop.f32.mrf.mxu0 }
 0x3b7   : > { %v5039_v25 = vrot.slane %v5033_v13, %v5025_v9  ;;  %2884 = vst [vmem:[#allocation3] sm:$0x1] %v5033_v13  ;;  %v2196_v43 = vmax.f32 %v2195_v29, %v5023_v7 }
 0x3b8   : > { %v5045_v31 = vpop.f32.mrf.mxu0 }
 0x3b9   : > { %v2272_v33 = vsub.f32 %v4948_v20, %v5039_v25  ;;  %v2273_v35 = vsub.f32 %v4946_v19, %v5039_v25  ;;  %v2274_v37 = vsub.f32 %v4952_v22, %v5039_v25  ;;  %v2275_v44 = vsub.f32 %v4950_v21, %v5039_v25  ;;  %v5062_v20 = vpop.f32.mrf.mxu1 }
 0x3ba   : > { %v5053_v39 = vpop.f32.mrf.mxu0  ;;  %v2276_v19 = vsub.f32 %v4963_v26, %v5039_v25  ;;  %v2197_v56 = vmax.f32 %v2196_v43, %v5045_v31  ;;  %v2277_v57 = vsub.f32 %v4956_v24, %v5039_v25  ;;  %v2278_v60 = vsub.f32 %v4969_v30, %v5039_v25 }
 0x3bb   : > { %v2336_v48 = vmul.f32 1.442695, %v2272_v33  ;;  %v2338_v51 = vmul.f32 1.442695, %v2273_v35  ;;  %v2340_v53 = vmul.f32 1.442695, %v2274_v37  ;;  %v5071_v58 = vpop.f32.mrf.mxu1  ;;  %v2169_v26 = vmax.f32 %v5055_v40, %v5042_v27 }
 0x3bc   : > { %v5060_v46 = vpop.f32.mrf.mxu0  ;;  %v2342_v21 = vmul.f32 1.442695, %v2275_v44  ;;  %v2344_v61 = vmul.f32 1.442695, %v2276_v19  ;;  %v2198_v2 = vmax.f32 %v2197_v56, %v5035_v23  ;;  %v2279_v24 = vsub.f32 %v4966_v28, %v5039_v25 }
 0x3bd   : > { %4150 = vpow2.f32 %v2336_v48  ;;  %v5079_v0 = vpop.f32.mrf.mxu1  ;;  %v2346_v4 = vmul.f32 1.442695, %v2277_v57  ;;  %v2170_v5 = vmax.f32 %v2169_v26, %v5071_v58  ;;  %v2280_v30 = vsub.f32 %v4975_v34, %v5039_v25 }
 0x3be   : > { %v5066_v22 = vpop.f32.mrf.mxu0  ;;  %4152 = vpow2.f32 %v2338_v51  ;;  %v2199_v8 = vmax.f32 %v2198_v2, %v5060_v46  ;;  %v2287_v11 = vsub.f32 %v4991_v45, %v5039_v25  ;;  %v2348_v29 = vmul.f32 1.442695, %v2278_v60 }
 0x3bf   : > { %4154 = vpow2.f32 %v2340_v53  ;;  %v2281_v35 = vsub.f32 %v4972_v32, %v5039_v25  ;;  %v5094_v28 = vpop.f32.mrf.mxu1  ;;  %v2286_v43 = vsub.f32 %v4994_v47, %v5039_v25  ;;  %v2350_v34 = vmul.f32 1.442695, %v2279_v24 }
 0x3c0   : > { %v5077_v63 = vpop.f32.mrf.mxu0  ;;  %4156 = vpow2.f32 %v2342_v21  ;;  %v2200_v37 = vmax.f32 %v2199_v8, %v5053_v39  ;;  %v2171_v44 = vmax.f32 %v2170_v5, %v5062_v20  ;;  %v2282_v45 = vsub.f32 %v4981_v38, %v5039_v25 }
 0x3c1   : > { %4158 = vpow2.f32 %v2344_v61  ;;  %v2352_v48 = vmul.f32 1.442695, %v2280_v30  ;;  %v2285_v32 = vsub.f32 %v4985_v41, %v5039_v25  ;;  %v2366_v53 = vmul.f32 1.442695, %v2287_v11 }
 0x3c2   : > { %v5090_v33 = vpop.f32.mrf.mxu0  ;;  %4160 = vpow2.f32 %v2346_v4  ;;  %v2201_v51 = vmax.f32 %v2200_v37, %v5077_v63  ;;  %v5103_v19 = vpop.f32.mrf.mxu1  ;;  %v2172_v56 = vmax.f32 %v2171_v44, %v5094_v28  ;;  %v2283_v57 = vsub.f32 %v4978_v36, %v5039_v25 }
 0x3c3   : > { %4162 = vpow2.f32 %v2348_v29  ;;  %v2354_v21 = vmul.f32 1.442695, %v2281_v35  ;;  %v2284_v61 = vsub.f32 %v4987_v42, %v5039_v25  ;;  %v2364_v26 = vmul.f32 1.442695, %v2286_v43 }
 0x3c4   : > { %v5108_v47 = vpop.f32.mrf.mxu0  ;;  %v2202_v38 = vmax.f32 %v2201_v51, %v5066_v22  ;;  %4164 = vpow2.f32 %v2350_v34  ;;  %v2356_v2 = vmul.f32 1.442695, %v2282_v45  ;;  %v5119_v24 = vpop.f32.mrf.mxu1  ;;  %v2362_v5 = vmul.f32 1.442695, %v2285_v32 }
 0x3c5   : > { %4166 = vpow2.f32 %v2352_v48  ;;  %v2173_v30 = vmax.f32 %v2172_v56, %v5079_v0  ;;  %v2358_v42 = vmul.f32 1.442695, %v2283_v57  ;;  %v2360_v29 = vmul.f32 1.442695, %v2284_v61 }
 0x3c6   : > { %v2203_v4 = vmax.f32 %v2202_v38, %v5108_v47  ;;  %4168 = vpow2.f32 %v2366_v53 }
 0x3c7   : > { %4170 = vpow2.f32 %v2354_v21  ;;  %v2174_v37 = vmax.f32 %v2173_v30, %v5119_v24 }
 0x3c8   : > { %v2204_v25 = vmax.f32 %v2203_v4, %v5090_v33  ;;  %4172 = vpow2.f32 %v2364_v26 }
 0x3c9   : > { %4174 = vpow2.f32 %v2356_v2  ;;  %v2175_v53 = vmax.f32 %v2174_v37, %v5103_v19  ;;  %v2236_v2 = vsub.f32 %v5021_v6, %v5033_v13 }
 0x3ca   : > { %v5113_v60 = vpop.eup %4150  ;;  %v5128_v11 = vpop.f32.mrf.mxu1  ;;  %v2205_v34 = vrot.slane %v2204_v25, 4  ;;  %4176 = vpow2.f32 %v2362_v5 }
 0x3cb   : > { %v5117_v41 = vpop.eup %4152  ;;  %4178 = vpow2.f32 %v2358_v42 }
 0x3cc   : > { %v2472_v36 = vadd.f32 %v5117_v41, %v5113_v60  ;;  %v5125_v8 = vpop.eup %4154  ;;  %v2206_v48 = vmax.f32 %v2204_v25, %v2205_v34  ;;  %v5137_v51 = vpop.f32.mrf.mxu1  ;;  %4180 = vpow2.f32 %v2360_v29 }
 0x3cd   : > { %v5132_v43 = vpop.eup %4156  ;;  %v2176_v61 = vmax.f32 %v2175_v53, %v5137_v51 }
 0x3ce   : > { %v2473_v35 = vadd.f32 %v5125_v8, %v2472_v36  ;;  %v5135_v45 = vpop.eup %4158  ;;  %v2207_v57 = vrot.slane %v2206_v48, 2 }
 0x3cf   : > { %v5141_v56 = vpop.eup %4160  ;;  %v2177_v37 = vmax.f32 %v2176_v61, %v5128_v11 }
 0x3d0   : > { %v2474_v44 = vadd.f32 %v5132_v43, %v2473_v35  ;;  %v5147_v26 = vpop.eup %4162  ;;  %v2208_v4 = vmax.f32 %v2206_v48, %v2207_v57  ;;  %v5157_v35 = vld [vmem:[#allocation3 + $0x2] sm:$0x1] }
 0x3d1   : > { %v5152_v36 = vpop.eup %4164 }
 0x3d2   : > { %v2475_v32 = vadd.f32 %v5135_v45, %v2474_v44  ;;  %v5143_v21 = vpop.f32.mrf.mxu1  ;;  %v2209_v30 = vrot.slane %v2208_v4, 1  ;;  %v4167_v25 = vpop.eup %4166  ;;  %v2240_v44 = vmul.f32 1.442695, %v2236_v2 }
 0x3d3   : > { %v4169_v34 = vpop.eup %4168 }
 0x3d4   : > { %v2476_v38 = vadd.f32 %v5141_v56, %v2475_v32  ;;  %v5154_v42 = vpop.f32.mrf.mxu1  ;;  %v2210_v32 = vmax.f32 %v2208_v4, %v2209_v30  ;;  %v4171_v6 = vpop.eup %4170  ;;  %3846 = vmatpush3.msra.mxu0 %v4169_v34  ;;  %4182 = vpow2.f32 %v2240_v44 }
 0x3d5   : > { %v2178_v48 = vmax.f32 %v2177_v37, %v5154_v42  ;;  %v4173_v57 = vpop.eup %4172  ;;  %3847 = vmatprep.subr.mxu0 %v4458_v15 }
 0x3d6   : > { %v2477_v5 = vadd.f32 %v5147_v26, %v2476_v38  ;;  %v5164_v38 = vmax.f32 %v5157_v35, %v2210_v32  ;;  %3848 = vmatpush3.msra.mxu0 %v4173_v57 }
 0x3d7   : > { %3849 = vmatprep.subr.mxu0 %v4458_v15  ;;  %v2179_v37 = vmax.f32 %v2178_v48, %v5143_v21 }
 0x3d8   : > { %v2478_v29 = vadd.f32 %v5152_v36, %v2477_v5  ;;  %v4175_v5 = vpop.eup %4174  ;;  %v5169_v2 = vrot.slane %v5164_v38, %v5025_v9  ;;  %2886 = vst [vmem:[#allocation3 + $0x2] sm:$0x1] %v5164_v38 }
 0x3d9   : > { %v4177_v61 = vpop.eup %4176 }
 0x3da   : > { %v5160_v53 = vpop.f32.mrf.mxu1  ;;  %v2479_v13 = vadd.f32 %v4167_v25, %v2478_v29  ;;  %v4179_v30 = vpop.eup %4178  ;;  %3850 = vmatpush3.msra.mxu0 %v4177_v61  ;;  %v2304_v44 = vsub.f32 %v5002_v52, %v5169_v2  ;;  %v2305_v17 = vsub.f32 %v4997_v49, %v5169_v2  ;;  %v2307_v52 = vsub.f32 %v5004_v54, %v5169_v2 }
 0x3db   : > { %v4181_v32 = vpop.eup %4180  ;;  %3851 = vmatprep.subr.mxu0 %v4458_v15 }
 0x3dc   : > { %v2480_v1 = vadd.f32 %v4171_v6, %v2479_v13  ;;  %v5173_v4 = vpop.f32.mrf.mxu1  ;;  %3852 = vmatpush3.msra.mxu0 %v4181_v32  ;;  %v2402_v18 = vmul.f32 1.442695, %v2305_v17  ;;  %v2309_v17 = vsub.f32 %v5013_v62, %v5169_v2 }
 0x3dd   : > { %5805 = vst [vmem:[#allocation30_spill] sm:$0xff] %v5173_v4  ;;  %v2180_v50 = vmax.f32 %v2179_v37, %v5173_v4  ;;  %3853 = vmatprep.subr.mxu0 %v4458_v15 }
 0x3de   : > { %v2481_v29 = vadd.f32 %v4175_v5, %v2480_v1  ;;  %v2306_v1 = vsub.f32 %v5010_v59, %v5169_v2  ;;  %3854 = vmatpush3.msra.mxu0 %v4179_v30  ;;  %v2308_v59 = vsub.f32 %v5018_v3, %v5169_v2 }
 0x3df   : > { %3855 = vmatprep.subr.mxu0 %v4458_v15  ;;  %v2181_v37 = vmax.f32 %v2180_v50, %v5160_v53  ;;  %v2406_v50 = vmul.f32 1.442695, %v2307_v52  ;;  %v2312_v52 = vsub.f32 %v5045_v31, %v5169_v2  ;;  %v2313_v31 = vsub.f32 %v5035_v23, %v5169_v2 }
 0x3e0   : > { %v2482_v13 = vadd.f32 %v4179_v30, %v2481_v29  ;;  %v2400_v29 = vmul.f32 1.442695, %v2304_v44  ;;  %3856 = vmatpush3.msra.mxu0 %v4175_v5  ;;  %v2464_v44 = vld [vmem:[#allocation4] sm:$0x1] }
 0x3e1   : > { %3857 = vmatprep.subr.mxu0 %v4458_v15 }
 0x3e2   : > { %v5182_v14 = vpop.f32.mrf.mxu1  ;;  %v2483_v48 = vadd.f32 %v4181_v32, %v2482_v13  ;;  %v2404_v32 = vmul.f32 1.442695, %v2306_v1  ;;  %4184 = vpow2.f32 %v2400_v29  ;;  %3858 = vmatpush3.msra.mxu0 %v4171_v6  ;;  %v2408_v6 = vmul.f32 1.442695, %v2308_v59 }
 0x3e3   : > { %4186 = vpow2.f32 %v2402_v18  ;;  %3859 = vmatprep.subr.mxu0 %v4458_v15 }
 0x3e4   : > { %v5187_v10 = vpop.f32.mrf.mxu1  ;;  %v2484_v49 = vadd.f32 %v4177_v61, %v2483_v48  ;;  %3860 = vmatpush3.msra.mxu0 %v4167_v25  ;;  %4188 = vpow2.f32 %v2404_v32  ;;  %v5209_v61 = vpop.eup %4182 }
 0x3e5   : > { %v2182_v54 = vmax.f32 %v2181_v37, %v5187_v10  ;;  %3861 = vmatprep.subr.mxu0 %v4458_v15  ;;  %4190 = vpow2.f32 %v2406_v50  ;;  %v2468_v37 = vmul.f32 %v5209_v61, %v2464_v44  ;;  %v2315_v44 = vsub.f32 %v5053_v39, %v5169_v2 }
 0x3e6   : > { %v5193_v4 = vpop.f32.mrf.mxu1  ;;  %v2485_v30 = vadd.f32 %v4173_v57, %v2484_v49  ;;  %v2310_v57 = vsub.f32 %v5030_v12, %v5169_v2  ;;  %3862 = vmatpush3.msra.mxu0 %v5152_v36  ;;  %v2311_v12 = vsub.f32 %v5023_v7, %v5169_v2  ;;  %v2319_v7 = vsub.f32 %v5090_v33, %v5169_v2 }
 0x3e7   : > { %v2183_v18 = vmax.f32 %v2182_v54, %v5182_v14  ;;  %3863 = vmatprep.subr.mxu0 %v4458_v15  ;;  %4192 = vpow2.f32 %v2408_v6  ;;  %v2318_v33 = vsub.f32 %v5108_v47, %v5169_v2  ;;  %v2316_v39 = vsub.f32 %v5077_v63, %v5169_v2 }
 0x3e8   : > { %v5199_v13 = vpop.f32.mrf.mxu1  ;;  %v2486_v5 = vadd.f32 %v4169_v34, %v2485_v30  ;;  %v2410_v34 = vmul.f32 1.442695, %v2309_v17  ;;  %3864 = vmatpush3.msra.mxu0 %v5147_v26  ;;  %v2412_v59 = vmul.f32 1.442695, %v2310_v57  ;;  %v2314_v17 = vsub.f32 %v5060_v46, %v5169_v2 }
 0x3e9   : > { %v2211_v62 = vmax.f32 %v5199_v13, %v5193_v4  ;;  %v2184_v36 = vrot.slane %v2183_v18, 4  ;;  %3865 = vmatprep.subr.mxu0 %v4458_v15  ;;  %v2414_v50 = vmul.f32 1.442695, %v2311_v12  ;;  %v2416_v57 = vmul.f32 1.442695, %v2312_v52 }
 0x3ea   : > { %v5204_v3 = vpop.f32.mrf.mxu1  ;;  %v2487_v1 = vrot.slane %v2486_v5, 4  ;;  %3866 = vmatpush3.msra.mxu0 %v5141_v56  ;;  %4194 = vpow2.f32 %v2410_v34  ;;  %v2317_v46 = vsub.f32 %v5066_v22, %v5169_v2  ;;  %v2430_v47 = vmul.f32 1.442695, %v2319_v7 }
 0x3eb   : > { %v2185_v26 = vmax.f32 %v2183_v18, %v2184_v36  ;;  %3867 = vmatprep.subr.mxu0 %v4458_v15  ;;  %4196 = vpow2.f32 %v2412_v59  ;;  %v2418_v18 = vmul.f32 1.442695, %v2313_v31  ;;  %v2420_v22 = vmul.f32 1.442695, %v2314_v17 }
 0x3ec   : > { %v5215_v25 = vpop.f32.mrf.mxu1  ;;  %v2488_v48 = vadd.f32 %v2487_v1, %v2486_v5  ;;  %3868 = vmatpush3.msra.mxu0 %v5135_v45  ;;  %4198 = vpow2.f32 %v2414_v50  ;;  %v1221_v59 = vadd.f32 %v5006_v55, %v4940_v16  ;;  %v2426_v63 = vmul.f32 1.442695, %v2317_v46 }
 0x3ed   : > { %v2212_v49 = vmax.f32 %v2211_v62, %v5215_v25  ;;  %v2186_v23 = vrot.slane %v2185_v26, 2  ;;  %3869 = vmatprep.subr.mxu0 %v4458_v15  ;;  %4200 = vpow2.f32 %v2416_v57  ;;  %v2424_v16 = vmul.f32 1.442695, %v2316_v39 }
 0x3ee   : > { %v5224_v29 = vpop.f32.mrf.mxu1  ;;  %v2489_v32 = vrot.slane %v2488_v48, 2  ;;  %3870 = vmatpush3.msra.mxu0 %v5132_v43  ;;  %4202 = vpow2.f32 %v2430_v47 }
 0x3ef   : > { %v2213_v54 = vmax.f32 %v2212_v49, %v5204_v3  ;;  %v2187_v45 = vmax.f32 %v2185_v26, %v2186_v23  ;;  %v5254_v34 = vpop.eup %4184  ;;  %3871 = vmatprep.subr.mxu0 %v4458_v15  ;;  %4204 = vpow2.f32 %v2418_v18 }
 0x3f0   : > { %v5233_v30 = vpop.f32.mrf.mxu1  ;;  %v2490_v5 = vadd.f32 %v2489_v32, %v2488_v48  ;;  %v2428_v48 = vmul.f32 1.442695, %v2318_v33  ;;  %v5259_v52 = vpop.eup %4186  ;;  %3872 = vmatpush3.msra.mxu0 %v5125_v8  ;;  %v5269_v32 = vld [vmem:[#allocation3 + $0x1] sm:$0x1]  ;;  %v2422_v8 = vmul.f32 1.442695, %v2315_v44 }
 0x3f1   : > { %v2214_v56 = vmax.f32 %v2213_v54, %v5233_v30  ;;  %v2188_v43 = vrot.slane %v2187_v45, 1  ;;  %v2514_v2 = vadd.f32 %v5259_v52, %v5254_v34  ;;  %3873 = vmatprep.subr.mxu0 %v4458_v15  ;;  %v5272_v31 = vpop.eup %4188 }
 0x3f2   : > { %v5243_v6 = vpop.f32.mrf.mxu1  ;;  %v2491_v1 = vrot.slane %v2490_v5, 1  ;;  %3874 = vmatpush3.msra.mxu0 %v5117_v41  ;;  %4206 = vpow2.f32 %v2428_v48  ;;  %v5280_v50 = vpop.eup %4190 }
 0x3f3   : > { %v2215_v12 = vmax.f32 %v2214_v56, %v5224_v29  ;;  %v2189_v54 = vmax.f32 %v2187_v45, %v2188_v43  ;;  %v2515_v55 = vadd.f32 %v5272_v31, %v2514_v2  ;;  %3875 = vmatprep.subr.mxu0 %v4458_v15  ;;  %4208 = vpow2.f32 %v2420_v22 }
 0x3f4   : > { %v5251_v62 = vpop.f32.mrf.mxu1  ;;  %v2492_v36 = vadd.f32 %v2491_v1, %v2490_v5  ;;  %3876 = vmatpush3.msra.mxu0 %v5113_v60  ;;  %4210 = vpow2.f32 %v2426_v63  ;;  %v5290_v57 = vpop.eup %4192 }
 0x3f5   : > { %v2216_v49 = vmax.f32 %v2215_v12, %v5251_v62  ;;  %v2516_v5 = vadd.f32 %v5280_v50, %v2515_v55  ;;  %3878 = vmatmul.mubr.f32.vlgmr.msra.gmra.mxu0 %v1221_v59  ;;  %3915 = vmatprep.subr.mxu0 %v4458_v15  ;;  %4212 = vpow2.f32 %v2422_v8 }
 0x3f6   : > { %v5263_v7 = vpop.f32.mrf.mxu1  ;;  %v2556_v26 = vadd.f32 %v2492_v36, %v2468_v37  ;;  %v5283_v37 = vmax.f32 %v5269_v32, %v2189_v54  ;;  %3947 = vmatprep.mubr.msk.f32.mxu0 %vm4459_vm7, %v4458_v15  ;;  %4214 = vpow2.f32 %v2424_v16  ;;  %v2238_v54 = vsub.f32 %v5157_v35, %v5164_v38 }
 0x3f7   : > { %v2217_v33 = vmax.f32 %v2216_v49, %v5243_v6  ;;  %v2517_v60 = vadd.f32 %v5290_v57, %v2516_v5  ;;  %v5303_v46 = vpop.eup %4194 }
 0x3f8   : > { %v5275_v17 = vpop.f32.mrf.mxu1  ;;  %2560 = vst [vmem:[#allocation4] sm:$0x1] %v2556_v26  ;;  %v5294_v23 = vrot.slane %v5283_v37, %v5025_v9  ;;  %2885 = vst [vmem:[#allocation3 + $0x1] sm:$0x1] %v5283_v37  ;;  %v5310_v45 = vpop.eup %4196 }
 0x3f9   : > { %v2218_v44 = vmax.f32 %v2217_v33, %v5275_v17  ;;  %v2518_v47 = vadd.f32 %v5303_v46, %v2517_v60  ;;  %v5318_v36 = vpop.eup %4198 }
 0x3fa   : > { %v5286_v41 = vpop.f32.mrf.mxu1  ;;  %v2288_v1 = vsub.f32 %v5055_v40, %v5294_v23  ;;  %v2289_v18 = vsub.f32 %v5042_v27, %v5294_v23  ;;  %v2290_v12 = vsub.f32 %v5071_v58, %v5294_v23  ;;  %v2291_v43 = vsub.f32 %v5062_v20, %v5294_v23  ;;  %v5322_v40 = vpop.eup %4200 }
 0x3fb   : > { %v2519_v22 = vadd.f32 %v5310_v45, %v2518_v47  ;;  %v2219_v48 = vmax.f32 %v2218_v44, %v5263_v7  ;;  %v5325_v63 = vpop.eup %4202  ;;  %v2292_v58 = vsub.f32 %v5094_v28, %v5294_v23  ;;  %v2293_v33 = vsub.f32 %v5079_v0, %v5294_v23 }
 0x3fc   : > { %v5297_v56 = vpop.f32.mrf.mxu1  ;;  %v2368_v49 = vmul.f32 1.442695, %v2288_v1  ;;  %v2370_v59 = vmul.f32 1.442695, %v2289_v18  ;;  %v2372_v2 = vmul.f32 1.442695, %v2290_v12  ;;  %v4205_v8 = vpop.eup %4204  ;;  %3916 = vmatpush3.msra.mxu0 %v5325_v63  ;;  %v2294_v35 = vsub.f32 %v5119_v24, %v5294_v23 }
 0x3fd   : > { %v2520_v27 = vadd.f32 %v5318_v36, %v2519_v22  ;;  %v2220_v16 = vmax.f32 %v2219_v48, %v5297_v56  ;;  %v2374_v28 = vmul.f32 1.442695, %v2291_v43  ;;  %3917 = vmatprep.subr.mxu0 %v4458_v15  ;;  %v2376_v38 = vmul.f32 1.442695, %v2292_v58 }
 0x3fe   : > { %v5314_v39 = vpop.f32.mrf.mxu1  ;;  %4216 = vpow2.f32 %v2368_v49  ;;  %v2244_v18 = vmul.f32 1.442695, %v2238_v54  ;;  %v2295_v48 = vsub.f32 %v5103_v19, %v5294_v23  ;;  %v2378_v43 = vmul.f32 1.442695, %v2293_v33 }
 0x3ff   : > { %v2521_v20 = vadd.f32 %v5322_v40, %v2520_v27  ;;  %v4207_v55 = vpop.eup %4206  ;;  %4218 = vpow2.f32 %v2370_v59  ;;  %v2221_v12 = vmax.f32 %v2220_v16, %v5286_v41  ;;  %v2296_v27 = vsub.f32 %v5137_v51, %v5294_v23 }
 0x400   : > { %v5329_v26 = vpop.f32.mrf.mxu1  ;;  %v4209_v5 = vpop.eup %4208  ;;  %3918 = vmatpush3.msra.mxu0 %v4207_v55  ;;  %4220 = vpow2.f32 %v2372_v2  ;;  %v2303_v59 = vsub.f32 %v5182_v14, %v5294_v23  ;;  %v2380_v58 = vmul.f32 1.442695, %v2294_v35  ;;  %v2297_v51 = vsub.f32 %v5128_v11, %v5294_v23 }
 0x401   : > { %v2522_v60 = vadd.f32 %v4205_v8, %v2521_v20  ;;  %v4211_v44 = vpop.eup %4210  ;;  %3919 = vmatprep.subr.mxu0 %v4458_v15  ;;  %4222 = vpow2.f32 %v2374_v28  ;;  %v2222_v49 = vmax.f32 %v2221_v12, %v5329_v26  ;;  %v2382_v20 = vmul.f32 1.442695, %v2295_v48 }
 0x402   : > { %v5342_v47 = vpop.f32.mrf.mxu1  ;;  %v4213_v1 = vpop.eup %4212  ;;  %3920 = vmatpush3.msra.mxu0 %v4211_v44  ;;  %4224 = vpow2.f32 %v2376_v38  ;;  %v2302_v14 = vsub.f32 %v5187_v10, %v5294_v23  ;;  %v2384_v33 = vmul.f32 1.442695, %v2296_v27  ;;  %v2398_v35 = vmul.f32 1.442695, %v2303_v59 }
 0x403   : > { %v2523_v0 = vadd.f32 %v4209_v5, %v2522_v60  ;;  %v4215_v22 = vpop.eup %4214  ;;  %3921 = vmatprep.subr.mxu0 %v4458_v15  ;;  %4226 = vpow2.f32 %v2244_v18  ;;  %v2223_v54 = vmax.f32 %v2222_v49, %v5314_v39  ;;  %v2298_v60 = vsub.f32 %v5154_v42, %v5294_v23 }
 0x404   : > { %3922 = vmatpush3.msra.mxu0 %v4215_v22  ;;  %v5354_v2 = vpop.f32.mrf.mxu1  ;;  %4228 = vpow2.f32 %v2378_v43  ;;  %v2301_v38 = vsub.f32 %v5160_v53, %v5294_v23  ;;  %v2299_v10 = vsub.f32 %v5143_v21, %v5294_v23  ;;  %v2386_v42 = vmul.f32 1.442695, %v2297_v51 }
 0x405   : > { %v2524_v24 = vadd.f32 %v4213_v1, %v2523_v0  ;;  %3923 = vmatprep.subr.mxu0 %v4458_v15  ;;  %v2224_v28 = vmax.f32 %v2223_v54, %v5354_v2  ;;  %4230 = vpow2.f32 %v2380_v58  ;;  %v2396_v53 = vmul.f32 1.442695, %v2302_v14 }
 0x406   : > { %3924 = vmatpush3.msra.mxu0 %v4213_v1  ;;  %4232 = vpow2.f32 %v2382_v20  ;;  %v2388_v12 = vmul.f32 1.442695, %v2298_v60  ;;  %v2394_v48 = vmul.f32 1.442695, %v2301_v38 }
 0x407   : > { %v2525_v19 = vadd.f32 %v4215_v22, %v2524_v24  ;;  %3925 = vmatprep.subr.mxu0 %v4458_v15  ;;  %4234 = vpow2.f32 %v2384_v33  ;;  %v2466_v33 = vld [vmem:[#allocation4 + $0x2] sm:$0x1] }
 0x408   : > { %3926 = vmatpush3.msra.mxu0 %v4209_v5  ;;  %v5806_v5 = vld [vmem:[#allocation30_spill] sm:$0xff]  ;;  %4236 = vpow2.f32 %v2398_v35 }
 0x409   : > { %v2526_v16 = vadd.f32 %v4211_v44, %v2525_v19  ;;  %3927 = vmatprep.subr.mxu0 %v4458_v15  ;;  %v2225_v44 = vmax.f32 %v2224_v28, %v5342_v47  ;;  %v2300_v18 = vsub.f32 %v5806_v5, %v5294_v23  ;;  %4238 = vpow2.f32 %v2386_v42 }
 0x40a   : > { %3928 = vmatpush3.msra.mxu0 %v4205_v8  ;;  %4240 = vpow2.f32 %v2396_v53 }
 0x40b   : > { %v2527_v11 = vadd.f32 %v4207_v55, %v2526_v16  ;;  %v5369_v1 = vpop.eup %4216  ;;  %3929 = vmatprep.subr.mxu0 %v4458_v15  ;;  %v2226_v8 = vrot.slane %v2225_v44, 4  ;;  %v2392_v49 = vmul.f32 1.442695, %v2300_v18  ;;  %4242 = vpow2.f32 %v2388_v12  ;;  %v5808_v12 = vld [vmem:[#allocation29_spill] sm:$0xff] }
 0x40c   : > { %v5376_v0 = vpop.eup %4218  ;;  %3930 = vmatpush3.msra.mxu0 %v5322_v40  ;;  %4244 = vpow2.f32 %v2394_v48 }
 0x40d   : > { %v2528_v55 = vadd.f32 %v5325_v63, %v2527_v11  ;;  %v2493_v21 = vadd.f32 %v5376_v0, %v5369_v1  ;;  %3931 = vmatprep.subr.mxu0 %v4458_v15  ;;  %v5383_v23 = vpop.eup %4220  ;;  %v2227_v43 = vmax.f32 %v2225_v44, %v2226_v8  ;;  %v2390_v63 = vmul.f32 1.442695, %v2299_v10  ;;  %v5807_v8 = vld [vmem:[#allocation26_spill] sm:$0xff] }
 0x40e   : > { %3932 = vmatpush3.msra.mxu0 %v5318_v36  ;;  %v5388_v40 = vpop.eup %4222 }
 0x40f   : > { %v2529_v22 = vrot.slane %v2528_v55, 4  ;;  %v2494_v24 = vadd.f32 %v5383_v23, %v2493_v21  ;;  %3933 = vmatprep.subr.mxu0 %v4458_v15  ;;  %v2228_v59 = vrot.slane %v2227_v43, 2  ;;  %v5393_v36 = vpop.eup %4224  ;;  %4246 = vpow2.f32 %v2390_v63 }
 0x410   : > { %3934 = vmatpush3.msra.mxu0 %v5310_v45  ;;  %v5396_v51 = vpop.eup %4226  ;;  %4248 = vpow2.f32 %v2392_v49  ;;  %v1231_v21 = vadd.f32 %v5808_v12, %v5807_v8 }
 0x411   : > { %v2530_v27 = vadd.f32 %v2529_v22, %v2528_v55  ;;  %v2495_v58 = vadd.f32 %v5388_v40, %v2494_v24  ;;  %3935 = vmatprep.subr.mxu0 %v4458_v15  ;;  %v2229_v54 = vmax.f32 %v2227_v43, %v2228_v59  ;;  %v5400_v45 = vpop.eup %4228  ;;  %v2237_v43 = vsub.f32 %v5269_v32, %v5283_v37 }
 0x412   : > { %3936 = vmatpush3.msra.mxu0 %v5303_v46  ;;  %v5405_v46 = vld [vmem:[#allocation3 + $0x3] sm:$0x1]  ;;  %v5407_v60 = vpop.eup %4230 }
 0x413   : > { %v2531_v19 = vrot.slane %v2530_v27, 2  ;;  %v2496_v20 = vadd.f32 %v5393_v36, %v2495_v58  ;;  %3937 = vmatprep.subr.mxu0 %v4458_v15  ;;  %v2230_v14 = vrot.slane %v2229_v54, 1  ;;  %v5412_v44 = vpop.eup %4232 }
 0x414   : > { %3938 = vmatpush3.msra.mxu0 %v5290_v57  ;;  %v2470_v57 = vmul.f32 %v5396_v51, %v2466_v33  ;;  %v5419_v18 = vpop.eup %4234 }
 0x415   : > { %v2532_v16 = vadd.f32 %v2531_v19, %v2530_v27  ;;  %v2497_v28 = vadd.f32 %v5400_v45, %v2496_v20  ;;  %3939 = vmatprep.subr.mxu0 %v4458_v15  ;;  %v2231_v11 = vmax.f32 %v2229_v54, %v2230_v14 }
 0x416   : > { %3940 = vmatpush3.msra.mxu0 %v5280_v50  ;;  %v4237_v50 = vpop.eup %4236 }
 0x417   : > { %v2533_v35 = vrot.slane %v2532_v16, 1  ;;  %v2498_v38 = vadd.f32 %v5407_v60, %v2497_v28  ;;  %3941 = vmatprep.subr.mxu0 %v4458_v15  ;;  %v5416_v5 = vmax.f32 %v5405_v46, %v2231_v11  ;;  %3881 = vmatpush3.msra.mxu1 %v4237_v50  ;;  %v4239_v22 = vpop.eup %4238 }
 0x418   : > { %3942 = vmatpush3.msra.mxu0 %v5272_v31  ;;  %3882 = vmatprep.subr.mxu1 %v4458_v15  ;;  %v4241_v48 = vpop.eup %4240 }
 0x419   : > { %v2534_v10 = vadd.f32 %v2533_v35, %v2532_v16  ;;  %v2499_v42 = vadd.f32 %v5412_v44, %v2498_v38  ;;  %3943 = vmatprep.subr.mxu0 %v4458_v15  ;;  %v5425_v53 = vrot.slane %v5416_v5, %v5025_v9  ;;  %2887 = vst [vmem:[#allocation3 + $0x3] sm:$0x1] %v5416_v5  ;;  %v4243_v27 = vpop.eup %4242 }
 0x41a   : > { %3944 = vmatpush3.msra.mxu0 %v5259_v52  ;;  %3883 = vmatpush3.msra.mxu1 %v4241_v48 }
 0x41b   : > { %v2558_v55 = vadd.f32 %v2534_v10, %v2470_v57  ;;  %v2500_v31 = vadd.f32 %v5419_v18, %v2499_v42  ;;  %3945 = vmatprep.subr.mxu0 %v4458_v15  ;;  %v2320_v52 = vsub.f32 %v5199_v13, %v5425_v53  ;;  %v2321_v24 = vsub.f32 %v5193_v4, %v5425_v53 }
 0x41c   : > { %3946 = vmatpush3.msra.mxu0 %v5254_v34  ;;  %v2322_v49 = vsub.f32 %v5215_v25, %v5425_v53  ;;  %v4245_v34 = vpop.eup %4244  ;;  %3884 = vmatprep.subr.mxu1 %v4458_v15  ;;  %v2323_v32 = vsub.f32 %v5204_v3, %v5425_v53  ;;  %v2242_v13 = vmul.f32 1.442695, %v2237_v43  ;;  %v2324_v25 = vsub.f32 %v5233_v30, %v5425_v53 }
 0x41d   : > { %2562 = vst [vmem:[#allocation4 + $0x2] sm:$0x1] %v2558_v55  ;;  %v2501_v63 = vadd.f32 %v4239_v22, %v2500_v31  ;;  %3948 = vmatmul.mubr.f32.vlgmr.msra.gmra.mxu0 %v1231_v21  ;;  %v4247_v58 = vpop.eup %4246  ;;  %3885 = vmatpush3.msra.mxu1 %v4245_v34  ;;  %v2432_v54 = vmul.f32 1.442695, %v2320_v52  ;;  %v2434_v4 = vmul.f32 1.442695, %v2321_v24  ;;  %v2325_v3 = vsub.f32 %v5224_v29, %v5425_v53 }
 0x41e   : > { %v4249_v37 = vpop.eup %4248  ;;  %3886 = vmatprep.subr.mxu1 %v4458_v15  ;;  %v2436_v20 = vmul.f32 1.442695, %v2322_v49  ;;  %v2438_v14 = vmul.f32 1.442695, %v2323_v32  ;;  %v2326_v28 = vsub.f32 %v5251_v62, %v5425_v53  ;;  %v2440_v30 = vmul.f32 1.442695, %v2324_v25 }
 0x41f   : > { %v2502_v59 = vadd.f32 %v4243_v27, %v2501_v63  ;;  %3887 = vmatpush3.msra.mxu1 %v4249_v37  ;;  %4250 = vpow2.f32 %v2432_v54  ;;  %v2327_v11 = vsub.f32 %v5243_v6, %v5425_v53  ;;  %v2442_v29 = vmul.f32 1.442695, %v2325_v3 }
 0x420   : > { %3888 = vmatprep.subr.mxu1 %v4458_v15  ;;  %4252 = vpow2.f32 %v2434_v4  ;;  %v2328_v57 = vsub.f32 %v5275_v17, %v5425_v53  ;;  %v2335_v62 = vsub.f32 %v5342_v47, %v5425_v53  ;;  %v2444_v10 = vmul.f32 1.442695, %v2326_v28 }
 0x421   : > { %v2503_v19 = vadd.f32 %v4247_v58, %v2502_v59  ;;  %3889 = vmatpush3.msra.mxu1 %v4247_v58  ;;  %4254 = vpow2.f32 %v2242_v13  ;;  %v2329_v6 = vsub.f32 %v5263_v7, %v5425_v53  ;;  %v2446_v17 = vmul.f32 1.442695, %v2327_v11  ;;  %v5810_v13 = vld [vmem:[#allocation27_spill] sm:$0xff] }
 0x422   : > { %3890 = vmatprep.subr.mxu1 %v4458_v15  ;;  %4256 = vpow2.f32 %v2436_v20  ;;  %v2330_v47 = vsub.f32 %v5297_v56, %v5425_v53  ;;  %v2448_v8 = vmul.f32 1.442695, %v2328_v57  ;;  %v2462_v7 = vmul.f32 1.442695, %v2335_v62 }
 0x423   : > { %v2504_v16 = vadd.f32 %v4249_v37, %v2503_v19  ;;  %3891 = vmatpush3.msra.mxu1 %v4243_v27  ;;  %4258 = vpow2.f32 %v2438_v14  ;;  %v2450_v21 = vmul.f32 1.442695, %v2329_v6  ;;  %v2332_v56 = vsub.f32 %v5329_v26, %v5425_v53  ;;  %v5809_v37 = vld [vmem:[#allocation24_spill] sm:$0xff] }
 0x424   : > { %3892 = vmatprep.subr.mxu1 %v4458_v15  ;;  %4260 = vpow2.f32 %v2440_v30  ;;  %v1226_v19 = vadd.f32 %v5810_v13, %v5809_v37 }
 0x425   : > { %v2505_v33 = vadd.f32 %v4245_v34, %v2504_v16  ;;  %3893 = vmatpush3.msra.mxu1 %v4239_v22  ;;  %4262 = vpow2.f32 %v2442_v29  ;;  %v2456_v52 = vmul.f32 1.442695, %v2332_v56  ;;  %v5812_v56 = vld [vmem:[#allocation28_spill] sm:$0xff] }
 0x426   : > { %3894 = vmatprep.subr.mxu1 %v4458_v15  ;;  %4264 = vpow2.f32 %v2444_v10 }
 0x427   : > { %v2506_v35 = vadd.f32 %v4241_v48, %v2505_v33  ;;  %3895 = vmatpush3.msra.mxu1 %v5419_v18  ;;  %v2333_v18 = vsub.f32 %v5314_v39, %v5425_v53  ;;  %4266 = vpow2.f32 %v2446_v17  ;;  %v2465_v48 = vld [vmem:[#allocation4 + $0x1] sm:$0x1] }
 0x428   : > { %3896 = vmatprep.subr.mxu1 %v4458_v15  ;;  %4268 = vpow2.f32 %v2448_v8  ;;  %v2467_v8 = vld [vmem:[#allocation4 + $0x3] sm:$0x1] }
 0x429   : > { %v2507_v38 = vadd.f32 %v4237_v50, %v2506_v35  ;;  %v2334_v50 = vsub.f32 %v5354_v2, %v5425_v53  ;;  %3897 = vmatpush3.msra.mxu1 %v5412_v44  ;;  %v2331_v2 = vsub.f32 %v5286_v41, %v5425_v53  ;;  %v2458_v43 = vmul.f32 1.442695, %v2333_v18 }
 0x42a   : > { %3898 = vmatprep.subr.mxu1 %v4458_v15  ;;  %4270 = vpow2.f32 %v2462_v7 }
 0x42b   : > { %v2508_v42 = vrot.slane %v2507_v38, 4  ;;  %3899 = vmatpush3.msra.mxu1 %v5407_v60  ;;  %v2460_v31 = vmul.f32 1.442695, %v2334_v50  ;;  %v2452_v60 = vmul.f32 1.442695, %v2330_v47  ;;  %4272 = vpow2.f32 %v2450_v21  ;;  %v5811_v21 = vld [vmem:[#allocation25_spill] sm:$0xff] }
 0x42c   : > { %3900 = vmatprep.subr.mxu1 %v4458_v15  ;;  %v5479_v44 = vpop.eup %4250  ;;  %v2454_v53 = vmul.f32 1.442695, %v2331_v2 }
 0x42d   : > { %v2509_v55 = vadd.f32 %v2508_v42, %v2507_v38  ;;  %3901 = vmatpush3.msra.mxu1 %v5400_v45  ;;  %v5484_v39 = vpop.eup %4252  ;;  %4274 = vpow2.f32 %v2460_v31  ;;  %v1236_v31 = vadd.f32 %v5812_v56, %v5811_v21 }
 0x42e   : > { %3902 = vmatprep.subr.mxu1 %v4458_v15  ;;  %v5487_v41 = vpop.eup %4254  ;;  %v2535_v63 = vadd.f32 %v5484_v39, %v5479_v44  ;;  %4276 = vpow2.f32 %v2452_v60  ;;  %v2844_v60 = vld [vmem:[#allocation5] sm:$0xff] }
 0x42f   : > { %v2510_v12 = vrot.slane %v2509_v55, 2  ;;  %3903 = vmatpush3.msra.mxu1 %v5393_v36  ;;  %v5492_v26 = vpop.eup %4256  ;;  %v2469_v49 = vmul.f32 %v5487_v41, %v2465_v48  ;;  %4278 = vpow2.f32 %v2458_v43 }
 0x430   : > { %3904 = vmatprep.subr.mxu1 %v4458_v15  ;;  %v2536_v24 = vadd.f32 %v5492_v26, %v2535_v63  ;;  %v5497_v27 = vpop.eup %4258  ;;  %4280 = vpow2.f32 %v2454_v53 }
 0x431   : > { %v2511_v22 = vadd.f32 %v2510_v12, %v2509_v55  ;;  %3905 = vmatpush3.msra.mxu1 %v5388_v40  ;;  %v5503_v59 = vpop.eup %4260  ;;  %4282 = vpow2.f32 %v2456_v52 }
 0x432   : > { %3906 = vmatprep.subr.mxu1 %v4458_v15  ;;  %v2537_v36 = vadd.f32 %v5497_v27, %v2536_v24  ;;  %v4263_v32 = vpop.eup %4262 }
 0x433   : > { %v2512_v45 = vrot.slane %v2511_v22, 1  ;;  %3907 = vmatpush3.msra.mxu1 %v5383_v23  ;;  %v4265_v23 = vpop.eup %4264 }
 0x434   : > { %3908 = vmatprep.subr.mxu1 %v4458_v15  ;;  %v2538_v40 = vadd.f32 %v5503_v59, %v2537_v36  ;;  %v4267_v25 = vpop.eup %4266 }
 0x435   : > { %v2513_v34 = vadd.f32 %v2512_v45, %v2511_v22  ;;  %3909 = vmatpush3.msra.mxu1 %v5376_v0  ;;  %v4269_v0 = vpop.eup %4268  ;;  %v2855_v22 = vrot.slane %v5209_v61, %v5025_v9  ;;  %v2846_v45 = vld [vmem:[#allocation5 + $0x8] sm:$0xff] }
 0x436   : > { %3910 = vmatprep.subr.mxu1 %v4458_v15  ;;  %v2539_v54 = vadd.f32 %v4263_v32, %v2538_v40 }
 0x437   : > { %v2557_v58 = vadd.f32 %v2513_v34, %v2469_v49  ;;  %3911 = vmatpush3.msra.mxu1 %v5369_v1  ;;  %v4271_v16 = vpop.eup %4270  ;;  %v2239_v1 = vsub.f32 %v5405_v46, %v5416_v5  ;;  %v2872_v48 = vmul.f32 %v2855_v22, %v2844_v60 }
 0x438   : > { %3913 = vmatmul.mubr.f32.vlgmr.msra.gmra.mxu1 %v1226_v19  ;;  %3950 = vmatprep.subr.mxu1 %v4458_v15  ;;  %v2540_v4 = vadd.f32 %v4265_v23, %v2539_v54  ;;  %v4273_v3 = vpop.eup %4272 }
 0x439   : > { %2561 = vst [vmem:[#allocation4 + $0x1] sm:$0x1] %v2557_v58  ;;  %3982 = vmatprep.mubr.msk.f32.mxu1 %vm4459_vm7, %v4458_v15  ;;  %3951 = vmatpush3.msra.mxu1 %v4271_v16  ;;  %v2246_v57 = vmul.f32 1.442695, %v2239_v1  ;;  %v2847_v58 = vld [vmem:[#allocation5 + $0x10] sm:$0xff] }
 0x43a   : > { %v2541_v20 = vadd.f32 %v4267_v25, %v2540_v4  ;;  %v4275_v33 = vpop.eup %4274  ;;  %3952 = vmatprep.subr.mxu1 %v4458_v15 }
 0x43b   : > { %v4277_v28 = vpop.eup %4276  ;;  %3953 = vmatpush3.msra.mxu1 %v4275_v33  ;;  %4284 = vpow2.f32 %v2246_v57 }
 0x43c   : > { %v2542_v14 = vadd.f32 %v4269_v0, %v2541_v20  ;;  %v4279_v35 = vpop.eup %4278  ;;  %3954 = vmatprep.subr.mxu1 %v4458_v15 }
 0x43d   : > { %v4281_v11 = vpop.eup %4280  ;;  %3955 = vmatpush3.msra.mxu1 %v4279_v35 }
 0x43e   : > { %v2543_v30 = vadd.f32 %v4273_v3, %v2542_v14  ;;  %v4283_v38 = vpop.eup %4282  ;;  %3956 = vmatprep.subr.mxu1 %v4458_v15 }
 0x43f   : > { %3957 = vmatpush3.msra.mxu1 %v4283_v38 }
 0x440   : > { %v2544_v29 = vadd.f32 %v4277_v28, %v2543_v30  ;;  %3958 = vmatprep.subr.mxu1 %v4458_v15 }
 0x441   : > { %3959 = vmatpush3.msra.mxu1 %v4281_v11 }
 0x442   : > { %v2545_v62 = vadd.f32 %v4281_v11, %v2544_v29  ;;  %3960 = vmatprep.subr.mxu1 %v4458_v15 }
 0x443   : > { %3961 = vmatpush3.msra.mxu1 %v4277_v28 }
 0x444   : > { %v2546_v10 = vadd.f32 %v4283_v38, %v2545_v62  ;;  %3962 = vmatprep.subr.mxu1 %v4458_v15 }
 0x445   : > { %3963 = vmatpush3.msra.mxu1 %v4273_v3 }
 0x446   : > { %v2547_v46 = vadd.f32 %v4279_v35, %v2546_v10  ;;  %3964 = vmatprep.subr.mxu1 %v4458_v15 }
 0x447   : > { %3965 = vmatpush3.msra.mxu1 %v4269_v0 }
 0x448   : > { %v2548_v5 = vadd.f32 %v4275_v33, %v2547_v46  ;;  %3966 = vmatprep.subr.mxu1 %v4458_v15  ;;  %v4285_v47 = vpop.eup %4284 }
 0x449   : > { %3967 = vmatpush3.msra.mxu1 %v4267_v25  ;;  %v2471_v7 = vmul.f32 %v4285_v47, %v2467_v8 }
 0x44a   : > { %v2549_v42 = vadd.f32 %v4271_v16, %v2548_v5  ;;  %3968 = vmatprep.subr.mxu1 %v4458_v15 }
 0x44b   : > { %3969 = vmatpush3.msra.mxu1 %v4265_v23 }
 0x44c   : > { %v2550_v6 = vrot.slane %v2549_v42, 4  ;;  %3970 = vmatprep.subr.mxu1 %v4458_v15 }
 0x44d   : > { %3971 = vmatpush3.msra.mxu1 %v4263_v32 }
 0x44e   : > { %v2551_v50 = vadd.f32 %v2550_v6, %v2549_v42  ;;  %3972 = vmatprep.subr.mxu1 %v4458_v15 }
 0x44f   : > { %3973 = vmatpush3.msra.mxu1 %v5503_v59  ;;  %v2867_v59 = vrot.slane %v4285_v47, %v5025_v9 }
 0x450   : > { %v2552_v17 = vrot.slane %v2551_v50, 2  ;;  %3974 = vmatprep.subr.mxu1 %v4458_v15 }
 0x451   : > { %3975 = vmatpush3.msra.mxu1 %v5497_v27  ;;  %v2845_v27 = vld [vmem:[#allocation5 + $0x18] sm:$0xff]  ;;  %v2875_v40 = vmul.f32 %v2867_v59, %v2847_v58 }
 0x452   : > { %v2553_v55 = vadd.f32 %v2552_v17, %v2551_v50  ;;  %3976 = vmatprep.subr.mxu1 %v4458_v15 }
 0x453   : > { %3977 = vmatpush3.msra.mxu1 %v5492_v26 }
 0x454   : > { %v2554_v18 = vrot.slane %v2553_v55, 1  ;;  %3978 = vmatprep.subr.mxu1 %v4458_v15 }
 0x455   : > { %3979 = vmatpush3.msra.mxu1 %v5484_v39  ;;  %v2863_v39 = vrot.slane %v5396_v51, %v5025_v9 }
 0x456   : > { %v2555_v12 = vadd.f32 %v2554_v18, %v2553_v55  ;;  %3980 = vmatprep.subr.mxu1 %v4458_v15 }
 0x457   : > { %3981 = vmatpush3.msra.mxu1 %v5479_v44  ;;  %v2874_v53 = vmul.f32 %v2863_v39, %v2846_v45  ;;  %v2859_v44 = vrot.slane %v5487_v41, %v5025_v9 }
 0x458   : > { %v2559_v2 = vadd.f32 %v2555_v12, %v2471_v7  ;;  %3983 = vmatmul.mubr.f32.vlgmr.msra.gmra.mxu1 %v1236_v31 }
 0x459   : > { %v2873_v61 = vmul.f32 %v2859_v44, %v2845_v27 }
 0x45a   : > { %2563 = vst [vmem:[#allocation4 + $0x3] sm:$0x1] %v2559_v2 }
 0x4b5   : > { %v2630_v43 = vpop.f32.mrf.mxu0 }
 0x4b6   : > { %v2876_v63 = vadd.f32 %v2872_v48, %v2630_v43 }
 0x4b7   : > { %v3879_v26 = vpop.f32.mrf.mxu0 }
 0x4b8   : > { %2880 = vst [vmem:[#allocation5] sm:$0xff] %v2876_v63 }
 0x4dd   : > { %v2770_v52 = vpop.f32.mrf.mxu0 }
 0x4de   : > { %v2878_v15 = vadd.f32 %v2874_v53, %v2770_v52 }
 0x4df   : > { %v3949_v24 = vpop.f32.mrf.mxu0 }
 0x4e0   : > { %2882 = vst [vmem:[#allocation5 + $0x8] sm:$0xff] %v2878_v15 }
 0x4f8   : > { %v2700_v49 = vpop.f32.mrf.mxu1 }
 0x4f9   : > { %v2877_v34 = vadd.f32 %v2873_v61, %v2700_v49 }
 0x4fa   : > { %v3914_v36 = vpop.f32.mrf.mxu1 }
 0x4fb   : > { %2881 = vst [vmem:[#allocation5 + $0x18] sm:$0xff] %v2877_v34 }
 0x517   : > { %2891 = sbr.rel (%p3491_p0) target bundleno = 1602 (0x642), region = 228 }
 0x518   : > { %v2840_v51 = vpop.f32.mrf.mxu1 }
 0x519   : > { %v2879_v32 = vadd.f32 %v2875_v40, %v2840_v51 }
 0x51a   : > { %v3984_v37 = vpop.f32.mrf.mxu1 }
 0x51b   : > { %2883 = vst [vmem:[#allocation5 + $0x10] sm:$0xff] %v2879_v32 }
 0x51c   : > { %v2895_v13 = vld [vmem:[#allocation4 + $0x3] sm:$0x1]  ;;  %v2894_v19 = vld [vmem:[#allocation4 + $0x2] sm:$0x1]  ;;  %v2893_v41 = vld [vmem:[#allocation4 + $0x1] sm:$0x1] }
 0x51d   : > { %4288 = vrcp.f32 %v2895_v13  ;;  %v4460_v54 = vmov 0   ;;  %v2892_v23 = vld [vmem:[#allocation4] sm:$0x1]  ;;  %v2938_v25 = vld [vmem:[%s5815_s11 + $0x10] sm:$0xff]  ;;  %v2941_v16 = vld [vmem:[%s5817_s12 + $0x8] sm:$0xff] }
 0x51e   : > { %4286 = vset.pattern.permute.xlu0 %v4460_v54  ;;  %4287 = vset.pattern.permute.xlu1 %v4460_v54  ;;  %4290 = vrcp.f32 %v2894_v19  ;;  %v2936_v4 = vld [vmem:[%s5814_s17] sm:$0xff]  ;;  %v2942_v20 = vld [vmem:[%s5817_s12 + $0x10] sm:$0xff]  ;;  %v2943_v3 = vld [vmem:[%s5817_s12 + $0x18] sm:$0xff]  ;;  %s5822_s17 = sld [smem:[#allocation44_spill]] }
 0x51f   : > { %4292 = vrcp.f32 %v2893_v41  ;;  %3993 = vmatprep.mubr.msk.f32.mxu0 %vm1109_vm5, %v2936_v4  ;;  %3996 = vmatprep.mubr.msk.f32.mxu1 %vm1109_vm5, %v2938_v25  ;;  %v2940_v0 = vld [vmem:[%s5816_s26] sm:$0xff]  ;;  %v3105_v33 = vld [vmem:[%s5819_s7 + $0x8] sm:$0xff]  ;;  %v3106_v30 = vld [vmem:[%s5819_s7 + $0x10] sm:$0xff]  ;;  %s5820_s26 = sld [smem:[#allocation42_spill]] }
 0x520   : > { %4294 = vrcp.f32 %v2892_v23  ;;  %2946 = vperm.xlu0 %4286, %v2940_v0   ;;  %2956 = vperm.xlu1 %4287, %v2942_v20   ;;  %v3104_v14 = vld [vmem:[%s5818_s28] sm:$0xff]  ;;  %v3107_v35 = vld [vmem:[%s5819_s7 + $0x18] sm:$0xff]  ;;  %v2906_v38 = vld [vmem:[#allocation5 + $0x8] sm:$0xff] }
 0x521   : > { %v2905_v46 = vld [vmem:[#allocation5 + $0x18] sm:$0xff]  ;;  %v2904_v47 = vld [vmem:[#allocation5] sm:$0xff]  ;;  %v2939_v48 = vld [vmem:[%s5815_s11 + $0x18] sm:$0xff] }
 0x522   : > { %v2907_v1 = vld [vmem:[#allocation5 + $0x10] sm:$0xff]  ;;  %v2937_v60 = vld [vmem:[%s5815_s11 + $0x8] sm:$0xff]  ;;  %v3062_v49 = vld [vmem:[%s4754_s18 + $0x8] sm:$0xff] }
 0x523   : > { %v3061_v36 = vld [vmem:[%s4754_s18] sm:$0xff]  ;;  %v3063_v32 = vld [vmem:[%s4754_s18 + $0x10] sm:$0xff] }
 0x524   : > { %2951 = vperm.xlu0 %4286, %v2941_v16   ;;  %2961 = vperm.xlu1 %4287, %v2943_v3   ;;  %s5823_s10 = scalar_lea.vmem %s5822_s17, %s4748_s0 }
 0x525   : > { %s5821_s2 = smov %s5820_s26  ;;  %v3132_v63 = vld [vmem:[%s5820_s26] sm:$0xff] }
 0x526   : > { %v3133_v26 = vld [vmem:[%s5821_s2 + $0x8] sm:$0xff]  ;;  %v3134_v45 = vld [vmem:[%s5821_s2 + $0x10] sm:$0xff]  ;;  %v3135_v53 = vld [vmem:[%s5821_s2 + $0x18] sm:$0xff] }
 0x528   : > { %3110 = vperm.xlu0 %4286, %v3104_v14   ;;  %3115 = vperm.xlu1 %4287, %v3105_v33  }
 0x52a   : > { %v4289_v28 = vpop.eup %4288 }
 0x52b   : > { %v4291_v11 = vpop.eup %4290  ;;  %v2927_v29 = vrot.slane %v4289_v28, %v5025_v9  ;;  %v3167_v17 = vmul.f32 %v4289_v28, %v2895_v13 }
 0x52c   : > { %v4293_v57 = vpop.eup %4292  ;;  %v2923_v62 = vrot.slane %v4291_v11, %v5025_v9  ;;  %v3166_v10 = vmul.f32 %v4291_v11, %v2894_v19  ;;  %3120 = vperm.xlu0 %4286, %v3106_v30   ;;  %3125 = vperm.xlu1 %4287, %v3107_v35  }
 0x52d   : > { %v4295_v5 = vpop.eup %4294  ;;  %v2935_v42 = vmul.f32 %v2927_v29, %v2907_v1  ;;  %v2919_v6 = vrot.slane %v4293_v57, %v5025_v9  ;;  %v3165_v50 = vmul.f32 %v4293_v57, %v2893_v41  ;;  %v3173_v22 = vsel %vm1000_vm3, %v3167_v17, 0.0  ;;  %v3064_v41 = vld [vmem:[%s4754_s18 + $0x18] sm:$0xff] }
 0x52e   : > { %v2934_v55 = vmul.f32 %v2923_v62, %v2906_v38  ;;  %v2915_v8 = vrot.slane %v4295_v5, %v5025_v9  ;;  %v3164_v18 = vmul.f32 %v4295_v5, %v2892_v23  ;;  %v3171_v2 = vsel %vm1000_vm3, %v3166_v10, 0.0 }
 0x52f   : > { %3985 = vmatprep.subr.mxu0 %v2935_v42  ;;  %3999 = vmatprep.subr.mxu1 %v2935_v42  ;;  %v2933_v7 = vmul.f32 %v2919_v6, %v2905_v46  ;;  %v3169_v12 = vsel %vm1000_vm3, %v3165_v50, 0.0 }
 0x530   : > { %3986 = vmatpush3.msra.mxu0 %v2935_v42  ;;  %4003 = vmatpush3.msra.mxu1 %v2935_v42  ;;  %v3168_v21 = vsel %vm1000_vm3, %v3164_v18, 0.0  ;;  %v2932_v56 = vmul.f32 %v2915_v8, %v2904_v47 }
 0x531   : > { %3987 = vmatprep.subr.mxu0 %v2934_v55  ;;  %4000 = vmatprep.subr.mxu1 %v2934_v55  ;;  %v3170_v31 = vadd.f32 %v3169_v12, %v3168_v21 }
 0x532   : > { %3988 = vmatpush3.msra.mxu0 %v2934_v55  ;;  %4004 = vmatpush3.msra.mxu1 %v2934_v55 }
 0x533   : > { %3989 = vmatprep.subr.mxu0 %v2933_v7  ;;  %4001 = vmatprep.subr.mxu1 %v2933_v7  ;;  %v3172_v9 = vadd.f32 %v3171_v2, %v3170_v31 }
 0x534   : > { %3990 = vmatpush3.msra.mxu0 %v2933_v7  ;;  %4005 = vmatpush3.msra.mxu1 %v2933_v7 }
 0x535   : > { %3991 = vmatprep.subr.mxu0 %v2932_v56  ;;  %v3174_v43 = vadd.f32 %v3173_v22, %v3172_v9  ;;  %4002 = vmatprep.subr.mxu1 %v2932_v56 }
 0x536   : > { %3992 = vmatpush3.msra.mxu0 %v2932_v56  ;;  %4006 = vmatpush3.msra.mxu1 %v2932_v56 }
 0x537   : > { %v3176_v39 = vmul.f32 0.25, %v3174_v43  ;;  %3994 = vmatmul.mubr.msk.f32.vlgmr.msra.gmra.mxu0 %vm1109_vm5, %v2937_v60  ;;  %3997 = vmatmul.mubr.msk.f32.vlgmr.msra.gmra.mxu1 %vm1109_vm5, %v2939_v48 }
 0x538   : > { %3138 = vperm.xlu0 %4286, %v3132_v63   ;;  %3143 = vperm.xlu1 %4287, %v3133_v26  }
 0x539   : > { %3177 = vst [vmem:[%s5823_s10] sm:$0x1] %v3176_v39 }
 0x53c   : > { %3148 = vperm.xlu0 %4286, %v3134_v45   ;;  %3153 = vperm.xlu1 %4287, %v3135_v53  }
 0x59b   : > { %v2947_v52 = vpop.permute.xlu0 %2946  ;;  %v2957_v15 = vpop.permute.xlu1 %2956 }
 0x59f   : > { %v2952_v24 = vpop.permute.xlu0 %2951  ;;  %v2962_v51 = vpop.permute.xlu1 %2961 }
 0x5a3   : > { %v3111_v12 = vpop.permute.xlu0 %3110  ;;  %v3116_v2 = vpop.permute.xlu1 %3115 }
 0x5a7   : > { %v3121_v21 = vpop.permute.xlu0 %3120  ;;  %v3126_v56 = vpop.permute.xlu1 %3125 }
 0x5b3   : > { %v3139_v31 = vpop.permute.xlu0 %3138  ;;  %v3144_v22 = vpop.permute.xlu1 %3143 }
 0x5f7   : > { %v3995_v44 = vpop.f32.mrf.mxu0  ;;  %v3998_v27 = vpop.f32.mrf.mxu1 }
 0x5f8   : > { %v3048_v61 = vadd.f32 %v3995_v44, %v2952_v24  ;;  %v3058_v13 = vadd.f32 %v3998_v27, %v2962_v51 }
 0x5f9   : > { %v3042_v34 = vpop.f32.mrf.mxu0  ;;  %v3052_v59 = vpop.f32.mrf.mxu1 }
 0x5fa   : > { %v3043_v58 = vadd.f32 %v3042_v34, %v2947_v52  ;;  %v3053_v40 = vadd.f32 %v3052_v59, %v2957_v15  ;;  %v3066_v37 = vadd.f32 %v3062_v49, %v3048_v61  ;;  %v3068_v4 = vadd.f32 %v3064_v41, %v3058_v13  ;;  %v3149_v52 = vpop.permute.xlu0 %3148  ;;  %v3154_v15 = vpop.permute.xlu1 %3153 }
 0x5fc   : > { %v3065_v19 = vadd.f32 %v3061_v36, %v3043_v58  ;;  %v3067_v23 = vadd.f32 %v3063_v32, %v3053_v40 }
 0x5fe   : > { %v3069_v54 = vadd.f32 %v3066_v37, %v3065_v19 }
 0x600   : > { %v3070_v25 = vadd.f32 %v3069_v54, %v3067_v23 }
 0x602   : > { %v3071_v0 = vadd.f32 %v3070_v25, %v3068_v4 }
 0x604   : > { %v3072_v20 = vrot.slane %v3071_v0, 4 }
 0x606   : > { %v3073_v16 = vadd.f32 %v3072_v20, %v3071_v0 }
 0x608   : > { %v3074_v3 = vrot.slane %v3073_v16, 2 }
 0x60a   : > { %v3075_v14 = vadd.f32 %v3074_v3, %v3073_v16 }
 0x60c   : > { %v3076_v33 = vrot.slane %v3075_v14, 1 }
 0x60e   : > { %v3077_v28 = vadd.f32 %v3076_v33, %v3075_v14 }
 0x610   : > { %v3079_v1 = vmul.f32 0.03125, %v3077_v28 }
 0x612   : > { %v3080_v30 = vsub.f32 %v3065_v19, %v3079_v1  ;;  %v3081_v35 = vsub.f32 %v3066_v37, %v3079_v1  ;;  %v3082_v11 = vsub.f32 %v3067_v23, %v3079_v1  ;;  %v3083_v29 = vsub.f32 %v3068_v4, %v3079_v1 }
 0x614   : > { %v3084_v38 = vmul.f32 %v3080_v30, %v3080_v30  ;;  %v3085_v57 = vmul.f32 %v3081_v35, %v3081_v35  ;;  %v3086_v62 = vmul.f32 %v3082_v11, %v3082_v11  ;;  %v3087_v46 = vmul.f32 %v3083_v29, %v3083_v29 }
 0x616   : > { %v3088_v10 = vadd.f32 %v3085_v57, %v3084_v38 }
 0x618   : > { %v3089_v5 = vadd.f32 %v3088_v10, %v3086_v62 }
 0x61a   : > { %v3090_v42 = vadd.f32 %v3089_v5, %v3087_v46 }
 0x61c   : > { %v3091_v6 = vrot.slane %v3090_v42, 4 }
 0x61e   : > { %v3092_v50 = vadd.f32 %v3091_v6, %v3090_v42 }
 0x620   : > { %v3093_v17 = vrot.slane %v3092_v50, 2 }
 0x622   : > { %v3094_v55 = vadd.f32 %v3093_v17, %v3092_v50 }
 0x624   : > { %v3095_v47 = vrot.slane %v3094_v55, 1 }
 0x626   : > { %v3096_v8 = vadd.f32 %v3095_v47, %v3094_v55 }
 0x628   : > { %v3097_v18 = vmul.f32 0.03125, %v3096_v8 }
 0x62a   : > { %v3098_v7 = vadd.f32 1e-05, %v3097_v18 }
 0x62c   : > { %4296 = vrsqrt.f32 %v3098_v7 }
 0x639   : > { %v4297_v9 = vpop.eup %4296 }
 0x63a   : > { %v3100_v60 = vmul.f32 %v4297_v9, %v3080_v30  ;;  %v3101_v48 = vmul.f32 %v4297_v9, %v3081_v35  ;;  %v3102_v43 = vmul.f32 %v4297_v9, %v3082_v11  ;;  %v3103_v63 = vmul.f32 %v4297_v9, %v3083_v29 }
 0x63c   : > { %v3128_v26 = vmul.f32 %v3111_v12, %v3100_v60  ;;  %v3129_v39 = vmul.f32 %v3116_v2, %v3101_v48  ;;  %v3130_v45 = vmul.f32 %v3121_v21, %v3102_v43  ;;  %v3131_v53 = vmul.f32 %v3126_v56, %v3103_v63 }
 0x63e   : > { %v3156_v24 = vadd.f32 %v3139_v31, %v3128_v26  ;;  %v3157_v44 = vadd.f32 %v3144_v22, %v3129_v39  ;;  %v3158_v27 = vadd.f32 %v3149_v52, %v3130_v45  ;;  %v3159_v61 = vadd.f32 %v3154_v15, %v3131_v53 }
 0x640   : > { %3160 = vst [vmem:[%s4759_s24] sm:$0xff] %v3156_v24  ;;  %3161 = vst [vmem:[%s4759_s24 + $0x8] sm:$0xff] %v3157_v44 }
 0x641   : > { %3162 = vst [vmem:[%s4759_s24 + $0x10] sm:$0xff] %v3158_v27  ;;  %3163 = vst [vmem:[%s4759_s24 + $0x18] sm:$0xff] %v3159_v61 }
 0x642 PF: > { %s5824_s0 = sld [smem:[#allocation17_spill]]  ;;  %s3200_s13 = sshll.u32 %s4759_s24, 4  ;;  %s5623_s13 = int_to_ptr.vmem [resolvable:$true] %s3200_s13 }
 0x643   : > { %s5825_s18 = sld [smem:[#allocation16_spill]]  ;;  %s5828_s30 = sand.u32 1, %s4422_s15  }
 0x644   : > { %s5826_s19 = sld [smem:[#allocation43_spill]]  ;;  %s5632_s26 = scalar_lea.sflag [#allocation11], %s5828_s30 }
 0x645   : > { %s4298_s7 = scalar_lea.vmem %s5623_s13, 512  ;;  %s4461_s24 = smov [#allocation10]  }
 0x646   : > { %p4299_p3 = scmp.ne.s32.totalorder %s5623_s13, %s4298_s7 }
 0x648   : > { %s3497_s6 = sshll.u32 %s5824_s0, 3  ;;  %p4300_p5 = pnand %p4299_p3, %p4695_p9 }
 0x649   : > { %s3197_s1 = sadd.s32 %s5825_s18, %s3497_s6  ;;  %s4302_s0 = sshll.u32 %s4461_s24, 4  ;;  %s4303_s0 = int_to_ptr.vmem [resolvable:$false] %s4302_s0 }
 0x64a   : > { %s3498_s3 = sshll.u32 %s3197_s1, 7  ;;  %s5827_s2 = smov %s5826_s19 }
 0x64b   : > { %s5628_s28 = scalar_lea.hbm %s5826_s19, %s3498_s3  ;;  %p4301_p7 = pneg %p4300_p5 }
 0x64c   : > { %s4304_s18 = scalar_lea.vmem %s4303_s0, 1024  ;;  %p4305_p8 = scmp.lt.s32.totalorder %s5623_s13, %s4303_s0 }
 0x64d   : > { %p4306_p12 = scmp.lt.s32.totalorder %s4304_s18, %s4298_s7 }
 0x64f   : > { %p4307_p1 = por %p4306_p12, %p4305_p8 }
 0x651   : > { %p4308_p2 = pnand %p4307_p1, %p4301_p7 }
 0x653   : > { %4311 = shalt.err (!%p4308_p2)
}
 0x654   : > { %s4312_s6 = scalar_lea.hbm %s5628_s28, 512  ;;  %s4316_s17 = scalar_lea.hbm %s5827_s2, 2048 }
 0x655   : > { %p4313_p4 = scmp.ne.s32.totalorder %s5628_s28, %s4312_s6  ;;  %p4317_p13 = scmp.lt.s32.totalorder %s5628_s28, %s5827_s2 }
 0x656   : > { %p4318_p0 = scmp.lt.s32.totalorder %s4316_s17, %s4312_s6 }
 0x657   : > { %p4314_p6 = pnand %p4313_p4, %p4695_p9 }
 0x658   : > { %p4319_p3 = por %p4318_p0, %p4317_p13 }
 0x659   : > { %p4315_p10 = pneg %p4314_p6 }
 0x65b   : > { %p4320_p5 = pnand %p4319_p3, %p4315_p10 }
 0x65d   : > { %4323 = shalt.err (!%p4320_p5)
}
 0x65e   : > { %s4462_s7 = smov 128   ;;  %s4463_s30 = smov 256  }
 0x65f   : > { %s4464_s24 = smov 8  }
 0x660   : > { %4007 = dma.vmem_to_hbm [thread:$0]  (%p4695_p9), %s5623_s13, 512, %s5628_s28, %s5632_s26, %s4462_s7, %s4463_s30, %s4464_s24  }
 0x661 PF: > { %p4013_p7 = scmp.ge.s32.totalorder %s4454_s23, 2  ;;  %s3218_s0 = sand.u32 1, %s4394_s25  }
 0x662   : > { %s3219_s18 = scalar_lea.sflag [#allocation11], %s3218_s0 }
 0x663   : > { %p4010_p8 = pnand %p4013_p7, %p4699_p11 }
 0x665   : > { %p4011_p12 = pneg %p4010_p8 }
 0x667   : > { %4389 = dma.done.wait (%p4011_p12), %s3219_s18, 512  }
 0x668   : > { %4391 = vsyncadd (%p4011_p12), %s3219_s18, 4294966784  ;;  %s27_s23 = sadd.s32 1, %s4454_s23   ;;  %s5830_s5 = sld [smem:[#allocation21_spill]] }
 0x669   : > { %p5660_p1 = scmp.ge.s32.totalorder %s27_s23, 10   ;;  %s5831_s13 = sld [smem:[#allocation23_spill]] }
 0x66a   : > { %s5832_s8 = sld [smem:[#allocation22_spill]]  ;;  %s5836_s25 = smov %s4422_s15 }
 0x66b   : > { %s5833_s1 = sld [smem:[#allocation18_spill]]  ;;  %s5837_s26 = smov %s4402_s27 }
 0x66c   : > { %s5834_s3 = sld [smem:[#allocation19_spill]]  ;;  %s5838_s27 = smov %s4676_s4 }
 0x66d   : > { %s5835_s10 = sld [smem:[#allocation20_spill]]  ;;  %s5839_s28 = smov %s4410_s29 }
 0x66e   : > { %s5840_s29 = smov %s5830_s5  ;;  %s5841_s30 = smov %s4418_s14 }
 0x66f   : > { %s5842_s14 = smov %s5831_s13  ;;  %s5843_s15 = smov %s4426_s16 }
 0x670   : > { %s5844_s16 = smov %s5832_s8  ;;  %s5845_s17 = smov %s4442_s20 }
 0x671   : > { %s5846_s18 = smov %s4446_s21  ;;  %s5847_s19 = smov %s4450_s22 }
 0x672   : > { %s5848_s20 = smov %s5833_s1  ;;  %s5849_s21 = smov %s5834_s3 }
 0x673   : > { %s5850_s22 = smov %s5835_s10  ;;  %26 = sbr.rel (!%p5660_p1) target bundleno = 24 (0x18), region = 304 }
 0x678   :  { %3234 = vsyncpa [#allocation11], 1 }
 0x679   :  { %3236 = vsyncpa [#allocation11 + $0x1], 1 }

</bundles_post_ra>
